<compile_context>
chip_gen: v6e
topology: v6e:2x2x1
jax: 0.10.0
libtpu: 0.0.40
codegen_flags: <defaults>
</compile_context>

<pallas_src>
import functools

import jax
import jax.numpy as jnp
import numpy as np
from jax.experimental import pallas as pl
from jax.experimental.pallas import tpu as pltpu


# ---------------------------------------------------------------------------
# Tap masks: mask[t=kh*3+kw] selects the x rows/cols that contribute to the
# spatial sum of conv tap (kh, kw) under 'same' zero padding.
# ---------------------------------------------------------------------------
def _tap_masks(H, W):
    m = np.zeros((9, H * W), np.float32)
    for kh in range(3):
        rows = np.ones((H,), np.float32)
        if kh == 0:
            rows[H - 1] = 0.0
        elif kh == 2:
            rows[0] = 0.0
        for kw in range(3):
            cols = np.ones((W,), np.float32)
            if kw == 0:
                cols[W - 1] = 0.0
            elif kw == 2:
                cols[0] = 0.0
            m[kh * 3 + kw] = np.outer(rows, cols).reshape(-1)
    return m


def _pick_cblk(cin):
    """Channel block: multiple of 8 dividing cin, aiming for >=4 k-steps."""
    if cin % 8 != 0:
        return cin                       # full-dim block (always legal)
    target = max(8, cin // 4)
    best, c = 8, 8
    while c <= target:
        if cin % c == 0:
            best = c
        c += 8
    return best


def _pick_tn(nout):
    """Nout tile: largest multiple of 128 dividing nout, capped at 4096."""
    best, t = None, 128
    while t <= min(nout, 4096):
        if nout % t == 0:
            best = t
        t += 128
    return best if best is not None else nout


# ---------------------------------------------------------------------------
# Kernel 1: mean-commuted conv3x3 + spatial mean.
#   grid = (B, Cin // cblk);  Cin axis is a reduction ("arbitrary").
# ---------------------------------------------------------------------------
def conv_mean_kernel(x_ref, m_ref, w_ref, b_ref, o_ref, acc_ref, *, inv_hw):
    # x_ref : (1, cblk, H*W)    VMEM   (flattened NCHW block)
    # m_ref : (9, H*W)          VMEM   (tap inclusion masks)
    # w_ref : (9, cblk, Cout)   VMEM   (repacked conv weights)
    # b_ref : (1, Cout)         VMEM
    # o_ref : (1, 1, Cout)      VMEM   (resident across the k axis)
    # acc_ref: (1, Cout) f32    VMEM scratch accumulator
    k = pl.program_id(1)

    @pl.when(k == 0)
    def _():
        acc_ref[...] = jnp.zeros_like(acc_ref)

    x = x_ref[0]                                   # (cblk, HW)
    cout = o_ref.shape[2]
    acc = jnp.zeros((1, cout), jnp.float32)
    for t in range(9):                             # 9 taps, fully unrolled
        # Per-channel tap sum: masked lane reduction over the spatial axis.
        tap = jnp.sum(x * m_ref[t:t + 1, :], axis=1, keepdims=True)   # (cblk, 1)
        # Contract over the channel block against this tap's weights.
        acc = acc + jnp.sum(tap * w_ref[t], axis=0, keepdims=True)    # (1, Cout)
    acc_ref[...] += acc

    @pl.when(k == pl.num_programs(1) - 1)
    def _():
        o_ref[0] = (acc_ref[...] * inv_hw + b_ref[...]).astype(o_ref.dtype)


def conv_mean(x_flat, masks, w9, bias2d, H, W):
    B, Cin, HW = x_flat.shape
    Cout = w9.shape[2]
    cblk = _pick_cblk(Cin)
    nk = Cin // cblk
    kernel = functools.partial(conv_mean_kernel, inv_hw=1.0 / float(H * W))
    out = pl.pallas_call(
        kernel,
        out_shape=jax.ShapeDtypeStruct((B, 1, Cout), jnp.float32),
        grid_spec=pltpu.PrefetchScalarGridSpec(
            num_scalar_prefetch=0,
            grid=(B, nk),
            in_specs=[
                pl.BlockSpec((1, cblk, HW), lambda b, k: (b, k, 0)),
                pl.BlockSpec((9, HW), lambda b, k: (0, 0)),
                pl.BlockSpec((9, cblk, Cout), lambda b, k: (0, k, 0)),
                pl.BlockSpec((1, Cout), lambda b, k: (0, 0)),
            ],
            out_specs=pl.BlockSpec((1, 1, Cout), lambda b, k: (b, 0, 0)),
            scratch_shapes=[pltpu.VMEM((1, Cout), jnp.float32)],
        ),
        compiler_params=pltpu.CompilerParams(
            dimension_semantics=("parallel", "arbitrary")),
    )(x_flat, masks, w9, bias2d)
    return out[:, 0, :]                                           # (B, Cout)


# ---------------------------------------------------------------------------
# Kernel 2: Nout-tiled FC  y = s @ W^T + b   (W streamed untransposed).
# ---------------------------------------------------------------------------
def fc_kernel(s_ref, w_ref, b_ref, o_ref):
    # s_ref: (B, Nin), w_ref: (tn, Nin), b_ref: (1, tn), o_ref: (B, tn)
    y = jax.lax.dot_general(
        s_ref[...], w_ref[...],
        dimension_numbers=(((1,), (1,)), ((), ())),   # contract Nin with Nin
        preferred_element_type=jnp.float32)
    o_ref[...] = (y + b_ref[...]).astype(o_ref.dtype)


def fc(s, w, bias2d):
    B, Nin = s.shape
    Nout = w.shape[0]
    tn = _pick_tn(Nout)
    nj = Nout // tn
    return pl.pallas_call(
        fc_kernel,
        out_shape=jax.ShapeDtypeStruct((B, Nout), jnp.float32),
        grid_spec=pltpu.PrefetchScalarGridSpec(
            num_scalar_prefetch=0,
            grid=(nj,),
            in_specs=[
                pl.BlockSpec((B, Nin), lambda j: (0, 0)),
                pl.BlockSpec((tn, Nin), lambda j: (j, 0)),
                pl.BlockSpec((1, tn), lambda j: (0, j)),
            ],
            out_specs=pl.BlockSpec((B, tn), lambda j: (0, j)),
        ),
        compiler_params=pltpu.CompilerParams(
            dimension_semantics=("parallel",)),
    )(s, w, bias2d)


# ---------------------------------------------------------------------------
# Full module forward.
# ---------------------------------------------------------------------------
@functools.partial(jax.jit, static_argnames=("inner_channel",))
def filter_predictor_s(x_nchw, conv_w, conv_b, fc_w, fc_b, *, inner_channel):
    B, Cin, H, W = x_nchw.shape
    ic = inner_channel
    # Free reshape of contiguous trailing dims (no transpose of x).
    x_flat = x_nchw.reshape(B, Cin, H * W)
    # (Cout, Cin, 3, 3) -> (9, Cin, Cout), row index = kh*3 + kw (small weight).
    w9 = jnp.transpose(conv_w, (2, 3, 1, 0)).reshape(9, Cin, ic)
    masks = jnp.asarray(_tap_masks(H, W))
    style = conv_mean(x_flat, masks, w9, conv_b.reshape(1, ic), H, W)  # (B, ic)
    y = fc(style, fc_w, fc_b.reshape(1, -1))                           # (B, 9*ic*ic)
    return y.reshape(B, ic, ic, 3, 3)


# ---------------------------------------------------------------------------
# Pure-JAX reference (mirrors the PyTorch forward).
# ---------------------------------------------------------------------------
def reference(x_nchw, conv_w, conv_b, fc_w, fc_b, inner_channel):
    B = x_nchw.shape[0]
    conv = jax.lax.conv_general_dilated(
        x_nchw, conv_w, window_strides=(1, 1), padding=((1, 1), (1, 1)),
        dimension_numbers=("NCHW", "OIHW", "NCHW"))
    conv = conv + conv_b[None, :, None, None]
    style = conv.reshape(B, inner_channel, -1).mean(axis=2)
    y = style @ fc_w.T + fc_b
    return y.reshape(B, inner_channel, inner_channel, 3, 3)


if __name__ == "__main__":
    # Small shapes consistent with the module (vgg_channel scaled down).
    B, CVGG, IC, H, W = 2, 64, 32, 16, 16

    key = jax.random.PRNGKey(0)
    k1, k2, k3, k4, k5 = jax.random.split(key, 5)
    conv_w = jax.random.normal(k1, (IC, CVGG, 3, 3), jnp.float32) / np.sqrt(CVGG * 9)
    conv_b = jax.random.normal(k2, (IC,), jnp.float32) * 0.01
    fc_w = jax.random.normal(k3, (9 * IC * IC, IC), jnp.float32) / np.sqrt(IC)
    fc_b = jax.random.normal(k4, (9 * IC * IC,), jnp.float32) * 0.01
    x = jax.random.normal(k5, (B, CVGG, H, W), jnp.float32)

    out = filter_predictor_s(x, conv_w, conv_b, fc_w, fc_b, inner_channel=IC)
    out = jax.block_until_ready(out)

    ref = reference(x, conv_w, conv_b, fc_w, fc_b, IC)
    assert out.shape == (B, IC, IC, 3, 3), out.shape
    np.testing.assert_allclose(np.asarray(out), np.asarray(ref),
                               rtol=1e-4, atol=1e-4)
    print("KERNEL_OK")
</pallas_src>

<mosaic_0001>
module attributes {stable_mosaic.version = 11 : i64} {
  func.func @conv_mean_kernel(%arg0: i32, %arg1: i32, %arg2: memref<1x16x256xf32, #tpu.memory_space<vmem>>, %arg3: memref<9x256xf32, #tpu.memory_space<vmem>>, %arg4: memref<9x16x32xf32, #tpu.memory_space<vmem>>, %arg5: memref<1x32xf32, #tpu.memory_space<vmem>>, %arg6: memref<1x1x32xf32, #tpu.memory_space<vmem>>, %arg7: memref<1x32xf32, #tpu.memory_space<vmem>>) attributes {dimension_semantics = [#tpu.dimension_semantics<parallel>, #tpu.dimension_semantics<arbitrary>], iteration_bounds = array<i64: 2, 4>, scalar_prefetch = 0 : i64, scratch_operands = 1 : i64, tpu.core_type = #tpu.core_type<tc>, window_params = [{transform_indices = @transform_0, window_bounds = array<i64: 1, 16, 256>}, {pipeline_mode = #tpu.pipeline_mode<synchronous>, transform_indices = @transform_1, window_bounds = array<i64: 9, 256>}, {transform_indices = @transform_2, window_bounds = array<i64: 9, 16, 32>}, {pipeline_mode = #tpu.pipeline_mode<synchronous>, transform_indices = @transform_3, window_bounds = array<i64: 1, 32>}, {transform_indices = @transform_4, window_bounds = array<i64: 1, 1, 32>}]} {
    %c0_i32 = arith.constant 0 : i32
    %0 = arith.cmpi eq, %arg1, %c0_i32 : i32
    %1 = arith.extui %0 : i1 to i32
    %c0_i32_0 = arith.constant 0 : i32
    %2 = arith.cmpi ne, %1, %c0_i32_0 : i32
    scf.if %2 {
      %cst_63 = arith.constant 0.000000e+00 : f32
      %120 = vector.broadcast %cst_63 : f32 to vector<1x32xf32>
      %c0_64 = arith.constant 0 : index
      %c0_65 = arith.constant 0 : index
      %121 = vector.load %arg7[%c0_64, %c0_65] : memref<1x32xf32, #tpu.memory_space<vmem>>, vector<1x32xf32>
      tpu.vector_store %arg7[%c0_64, %c0_65], %120 {strides = array<i32>} : memref<1x32xf32, #tpu.memory_space<vmem>>, vector<1x32xf32>,
    } else {
    }
    %c0 = arith.constant 0 : index
    %c0_1 = arith.constant 0 : index
    %c0_2 = arith.constant 0 : index
    %3 = vector.load %arg2[%c0, %c0_1, %c0_2] : memref<1x16x256xf32, #tpu.memory_space<vmem>>, vector<1x16x256xf32>
    %4 = vector.shape_cast %3 : vector<1x16x256xf32> to vector<16x256xf32>
    %cst = arith.constant 0.000000e+00 : f32
    %5 = vector.broadcast %cst : f32 to vector<1x32xf32>
    %c0_3 = arith.constant 0 : index
    %c0_4 = arith.constant 0 : index
    %6 = vector.load %arg3[%c0_3, %c0_4] : memref<9x256xf32, #tpu.memory_space<vmem>>, vector<1x256xf32>
    %7 = vector.broadcast %6 : vector<1x256xf32> to vector<16x256xf32>
    %8 = arith.mulf %4, %7 : vector<16x256xf32>
    %cst_5 = arith.constant dense<0.000000e+00> : vector<16xf32>
    %9 = vector.multi_reduction <add>, %8, %cst_5 [1] : vector<16x256xf32> to vector<16xf32>
    %10 = vector.shape_cast %9 : vector<16xf32> to vector<16x1xf32>
    %c0_6 = arith.constant 0 : index
    %c0_7 = arith.constant 0 : index
    %c0_8 = arith.constant 0 : index
    %11 = vector.load %arg4[%c0_6, %c0_7, %c0_8] : memref<9x16x32xf32, #tpu.memory_space<vmem>>, vector<1x16x32xf32>
    %12 = vector.shape_cast %11 : vector<1x16x32xf32> to vector<16x32xf32>
    %13 = vector.broadcast %10 : vector<16x1xf32> to vector<16x32xf32>
    %14 = arith.mulf %13, %12 : vector<16x32xf32>
    %cst_9 = arith.constant dense<0.000000e+00> : vector<32xf32>
    %15 = vector.multi_reduction <add>, %14, %cst_9 [0] : vector<16x32xf32> to vector<32xf32>
    %16 = vector.shape_cast %15 : vector<32xf32> to vector<1x32xf32>
    %17 = arith.addf %5, %16 : vector<1x32xf32>
    %c1 = arith.constant 1 : index
    %c0_10 = arith.constant 0 : index
    %18 = vector.load %arg3[%c1, %c0_10] : memref<9x256xf32, #tpu.memory_space<vmem>>, vector<1x256xf32>
    %19 = vector.broadcast %18 : vector<1x256xf32> to vector<16x256xf32>
    %20 = arith.mulf %4, %19 : vector<16x256xf32>
    %cst_11 = arith.constant dense<0.000000e+00> : vector<16xf32>
    %21 = vector.multi_reduction <add>, %20, %cst_11 [1] : vector<16x256xf32> to vector<16xf32>
    %22 = vector.shape_cast %21 : vector<16xf32> to vector<16x1xf32>
    %c1_12 = arith.constant 1 : index
    %c0_13 = arith.constant 0 : index
    %c0_14 = arith.constant 0 : index
    %23 = vector.load %arg4[%c1_12, %c0_13, %c0_14] : memref<9x16x32xf32, #tpu.memory_space<vmem>>, vector<1x16x32xf32>
    %24 = vector.shape_cast %23 : vector<1x16x32xf32> to vector<16x32xf32>
    %25 = vector.broadcast %22 : vector<16x1xf32> to vector<16x32xf32>
    %26 = arith.mulf %25, %24 : vector<16x32xf32>
    %cst_15 = arith.constant dense<0.000000e+00> : vector<32xf32>
    %27 = vector.multi_reduction <add>, %26, %cst_15 [0] : vector<16x32xf32> to vector<32xf32>
    %28 = vector.shape_cast %27 : vector<32xf32> to vector<1x32xf32>
    %29 = arith.addf %17, %28 : vector<1x32xf32>
    %c2 = arith.constant 2 : index
    %c0_16 = arith.constant 0 : index
    %30 = vector.load %arg3[%c2, %c0_16] : memref<9x256xf32, #tpu.memory_space<vmem>>, vector<1x256xf32>
    %31 = vector.broadcast %30 : vector<1x256xf32> to vector<16x256xf32>
    %32 = arith.mulf %4, %31 : vector<16x256xf32>
    %cst_17 = arith.constant dense<0.000000e+00> : vector<16xf32>
    %33 = vector.multi_reduction <add>, %32, %cst_17 [1] : vector<16x256xf32> to vector<16xf32>
    %34 = vector.shape_cast %33 : vector<16xf32> to vector<16x1xf32>
    %c2_18 = arith.constant 2 : index
    %c0_19 = arith.constant 0 : index
    %c0_20 = arith.constant 0 : index
    %35 = vector.load %arg4[%c2_18, %c0_19, %c0_20] : memref<9x16x32xf32, #tpu.memory_space<vmem>>, vector<1x16x32xf32>
    %36 = vector.shape_cast %35 : vector<1x16x32xf32> to vector<16x32xf32>
    %37 = vector.broadcast %34 : vector<16x1xf32> to vector<16x32xf32>
    %38 = arith.mulf %37, %36 : vector<16x32xf32>
    %cst_21 = arith.constant dense<0.000000e+00> : vector<32xf32>
    %39 = vector.multi_reduction <add>, %38, %cst_21 [0] : vector<16x32xf32> to vector<32xf32>
    %40 = vector.shape_cast %39 : vector<32xf32> to vector<1x32xf32>
    %41 = arith.addf %29, %40 : vector<1x32xf32>
    %c3 = arith.constant 3 : index
    %c0_22 = arith.constant 0 : index
    %42 = vector.load %arg3[%c3, %c0_22] : memref<9x256xf32, #tpu.memory_space<vmem>>, vector<1x256xf32>
    %43 = vector.broadcast %42 : vector<1x256xf32> to vector<16x256xf32>
    %44 = arith.mulf %4, %43 : vector<16x256xf32>
    %cst_23 = arith.constant dense<0.000000e+00> : vector<16xf32>
    %45 = vector.multi_reduction <add>, %44, %cst_23 [1] : vector<16x256xf32> to vector<16xf32>
    %46 = vector.shape_cast %45 : vector<16xf32> to vector<16x1xf32>
    %c3_24 = arith.constant 3 : index
    %c0_25 = arith.constant 0 : index
    %c0_26 = arith.constant 0 : index
    %47 = vector.load %arg4[%c3_24, %c0_25, %c0_26] : memref<9x16x32xf32, #tpu.memory_space<vmem>>, vector<1x16x32xf32>
    %48 = vector.shape_cast %47 : vector<1x16x32xf32> to vector<16x32xf32>
    %49 = vector.broadcast %46 : vector<16x1xf32> to vector<16x32xf32>
    %50 = arith.mulf %49, %48 : vector<16x32xf32>
    %cst_27 = arith.constant dense<0.000000e+00> : vector<32xf32>
    %51 = vector.multi_reduction <add>, %50, %cst_27 [0] : vector<16x32xf32> to vector<32xf32>
    %52 = vector.shape_cast %51 : vector<32xf32> to vector<1x32xf32>
    %53 = arith.addf %41, %52 : vector<1x32xf32>
    %c4 = arith.constant 4 : index
    %c0_28 = arith.constant 0 : index
    %54 = vector.load %arg3[%c4, %c0_28] : memref<9x256xf32, #tpu.memory_space<vmem>>, vector<1x256xf32>
    %55 = vector.broadcast %54 : vector<1x256xf32> to vector<16x256xf32>
    %56 = arith.mulf %4, %55 : vector<16x256xf32>
    %cst_29 = arith.constant dense<0.000000e+00> : vector<16xf32>
    %57 = vector.multi_reduction <add>, %56, %cst_29 [1] : vector<16x256xf32> to vector<16xf32>
    %58 = vector.shape_cast %57 : vector<16xf32> to vector<16x1xf32>
    %c4_30 = arith.constant 4 : index
    %c0_31 = arith.constant 0 : index
    %c0_32 = arith.constant 0 : index
    %59 = vector.load %arg4[%c4_30, %c0_31, %c0_32] : memref<9x16x32xf32, #tpu.memory_space<vmem>>, vector<1x16x32xf32>
    %60 = vector.shape_cast %59 : vector<1x16x32xf32> to vector<16x32xf32>
    %61 = vector.broadcast %58 : vector<16x1xf32> to vector<16x32xf32>
    %62 = arith.mulf %61, %60 : vector<16x32xf32>
    %cst_33 = arith.constant dense<0.000000e+00> : vector<32xf32>
    %63 = vector.multi_reduction <add>, %62, %cst_33 [0] : vector<16x32xf32> to vector<32xf32>
    %64 = vector.shape_cast %63 : vector<32xf32> to vector<1x32xf32>
    %65 = arith.addf %53, %64 : vector<1x32xf32>
    %c5 = arith.constant 5 : index
    %c0_34 = arith.constant 0 : index
    %66 = vector.load %arg3[%c5, %c0_34] : memref<9x256xf32, #tpu.memory_space<vmem>>, vector<1x256xf32>
    %67 = vector.broadcast %66 : vector<1x256xf32> to vector<16x256xf32>
    %68 = arith.mulf %4, %67 : vector<16x256xf32>
    %cst_35 = arith.constant dense<0.000000e+00> : vector<16xf32>
    %69 = vector.multi_reduction <add>, %68, %cst_35 [1] : vector<16x256xf32> to vector<16xf32>
    %70 = vector.shape_cast %69 : vector<16xf32> to vector<16x1xf32>
    %c5_36 = arith.constant 5 : index
    %c0_37 = arith.constant 0 : index
    %c0_38 = arith.constant 0 : index
    %71 = vector.load %arg4[%c5_36, %c0_37, %c0_38] : memref<9x16x32xf32, #tpu.memory_space<vmem>>, vector<1x16x32xf32>
    %72 = vector.shape_cast %71 : vector<1x16x32xf32> to vector<16x32xf32>
    %73 = vector.broadcast %70 : vector<16x1xf32> to vector<16x32xf32>
    %74 = arith.mulf %73, %72 : vector<16x32xf32>
    %cst_39 = arith.constant dense<0.000000e+00> : vector<32xf32>
    %75 = vector.multi_reduction <add>, %74, %cst_39 [0] : vector<16x32xf32> to vector<32xf32>
    %76 = vector.shape_cast %75 : vector<32xf32> to vector<1x32xf32>
    %77 = arith.addf %65, %76 : vector<1x32xf32>
    %c6 = arith.constant 6 : index
    %c0_40 = arith.constant 0 : index
    %78 = vector.load %arg3[%c6, %c0_40] : memref<9x256xf32, #tpu.memory_space<vmem>>, vector<1x256xf32>
    %79 = vector.broadcast %78 : vector<1x256xf32> to vector<16x256xf32>
    %80 = arith.mulf %4, %79 : vector<16x256xf32>
    %cst_41 = arith.constant dense<0.000000e+00> : vector<16xf32>
    %81 = vector.multi_reduction <add>, %80, %cst_41 [1] : vector<16x256xf32> to vector<16xf32>
    %82 = vector.shape_cast %81 : vector<16xf32> to vector<16x1xf32>
    %c6_42 = arith.constant 6 : index
    %c0_43 = arith.constant 0 : index
    %c0_44 = arith.constant 0 : index
    %83 = vector.load %arg4[%c6_42, %c0_43, %c0_44] : memref<9x16x32xf32, #tpu.memory_space<vmem>>, vector<1x16x32xf32>
    %84 = vector.shape_cast %83 : vector<1x16x32xf32> to vector<16x32xf32>
    %85 = vector.broadcast %82 : vector<16x1xf32> to vector<16x32xf32>
    %86 = arith.mulf %85, %84 : vector<16x32xf32>
    %cst_45 = arith.constant dense<0.000000e+00> : vector<32xf32>
    %87 = vector.multi_reduction <add>, %86, %cst_45 [0] : vector<16x32xf32> to vector<32xf32>
    %88 = vector.shape_cast %87 : vector<32xf32> to vector<1x32xf32>
    %89 = arith.addf %77, %88 : vector<1x32xf32>
    %c7 = arith.constant 7 : index
    %c0_46 = arith.constant 0 : index
    %90 = vector.load %arg3[%c7, %c0_46] : memref<9x256xf32, #tpu.memory_space<vmem>>, vector<1x256xf32>
    %91 = vector.broadcast %90 : vector<1x256xf32> to vector<16x256xf32>
    %92 = arith.mulf %4, %91 : vector<16x256xf32>
    %cst_47 = arith.constant dense<0.000000e+00> : vector<16xf32>
    %93 = vector.multi_reduction <add>, %92, %cst_47 [1] : vector<16x256xf32> to vector<16xf32>
    %94 = vector.shape_cast %93 : vector<16xf32> to vector<16x1xf32>
    %c7_48 = arith.constant 7 : index
    %c0_49 = arith.constant 0 : index
    %c0_50 = arith.constant 0 : index
    %95 = vector.load %arg4[%c7_48, %c0_49, %c0_50] : memref<9x16x32xf32, #tpu.memory_space<vmem>>, vector<1x16x32xf32>
    %96 = vector.shape_cast %95 : vector<1x16x32xf32> to vector<16x32xf32>
    %97 = vector.broadcast %94 : vector<16x1xf32> to vector<16x32xf32>
    %98 = arith.mulf %97, %96 : vector<16x32xf32>
    %cst_51 = arith.constant dense<0.000000e+00> : vector<32xf32>
    %99 = vector.multi_reduction <add>, %98, %cst_51 [0] : vector<16x32xf32> to vector<32xf32>
    %100 = vector.shape_cast %99 : vector<32xf32> to vector<1x32xf32>
    %101 = arith.addf %89, %100 : vector<1x32xf32>
    %c8 = arith.constant 8 : index
    %c0_52 = arith.constant 0 : index
    %102 = vector.load %arg3[%c8, %c0_52] : memref<9x256xf32, #tpu.memory_space<vmem>>, vector<1x256xf32>
    %103 = vector.broadcast %102 : vector<1x256xf32> to vector<16x256xf32>
    %104 = arith.mulf %4, %103 : vector<16x256xf32>
    %cst_53 = arith.constant dense<0.000000e+00> : vector<16xf32>
    %105 = vector.multi_reduction <add>, %104, %cst_53 [1] : vector<16x256xf32> to vector<16xf32>
    %106 = vector.shape_cast %105 : vector<16xf32> to vector<16x1xf32>
    %c8_54 = arith.constant 8 : index
    %c0_55 = arith.constant 0 : index
    %c0_56 = arith.constant 0 : index
    %107 = vector.load %arg4[%c8_54, %c0_55, %c0_56] : memref<9x16x32xf32, #tpu.memory_space<vmem>>, vector<1x16x32xf32>
    %108 = vector.shape_cast %107 : vector<1x16x32xf32> to vector<16x32xf32>
    %109 = vector.broadcast %106 : vector<16x1xf32> to vector<16x32xf32>
    %110 = arith.mulf %109, %108 : vector<16x32xf32>
    %cst_57 = arith.constant dense<0.000000e+00> : vector<32xf32>
    %111 = vector.multi_reduction <add>, %110, %cst_57 [0] : vector<16x32xf32> to vector<32xf32>
    %112 = vector.shape_cast %111 : vector<32xf32> to vector<1x32xf32>
    %113 = arith.addf %101, %112 : vector<1x32xf32>
    %c0_58 = arith.constant 0 : index
    %c0_59 = arith.constant 0 : index
    %114 = vector.load %arg7[%c0_58, %c0_59] : memref<1x32xf32, #tpu.memory_space<vmem>>, vector<1x32xf32>
    %115 = arith.addf %114, %113 : vector<1x32xf32>
    %c0_60 = arith.constant 0 : index
    %c0_61 = arith.constant 0 : index
    %116 = vector.load %arg7[%c0_60, %c0_61] : memref<1x32xf32, #tpu.memory_space<vmem>>, vector<1x32xf32>
    tpu.vector_store %arg7[%c0_60, %c0_61], %115 {strides = array<i32>} : memref<1x32xf32, #tpu.memory_space<vmem>>, vector<1x32xf32>,
    %c3_i32 = arith.constant 3 : i32
    %117 = arith.cmpi eq, %arg1, %c3_i32 : i32
    %118 = arith.extui %117 : i1 to i32
    %c0_i32_62 = arith.constant 0 : i32
    %119 = arith.cmpi ne, %118, %c0_i32_62 : i32
    scf.if %119 {
      %c0_63 = arith.constant 0 : index
      %c0_64 = arith.constant 0 : index
      %120 = vector.load %arg7[%c0_63, %c0_64] : memref<1x32xf32, #tpu.memory_space<vmem>>, vector<1x32xf32>
      %cst_65 = arith.constant 3.906250e-03 : f32
      %121 = vector.broadcast %cst_65 : f32 to vector<1x32xf32>
      %122 = arith.mulf %120, %121 : vector<1x32xf32>
      %c0_66 = arith.constant 0 : index
      %c0_67 = arith.constant 0 : index
      %123 = vector.load %arg5[%c0_66, %c0_67] : memref<1x32xf32, #tpu.memory_space<vmem>>, vector<1x32xf32>
      %124 = arith.addf %122, %123 : vector<1x32xf32>
      %c0_68 = arith.constant 0 : index
      %c0_69 = arith.constant 0 : index
      %c0_70 = arith.constant 0 : index
      %125 = vector.load %arg6[%c0_68, %c0_69, %c0_70] : memref<1x1x32xf32, #tpu.memory_space<vmem>>, vector<1x1x32xf32>
      %126 = vector.shape_cast %125 : vector<1x1x32xf32> to vector<1x32xf32>
      %127 = vector.shape_cast %124 : vector<1x32xf32> to vector<1x1x32xf32>
      tpu.vector_store %arg6[%c0_68, %c0_69, %c0_70], %127 {strides = array<i32>} : memref<1x1x32xf32, #tpu.memory_space<vmem>>, vector<1x1x32xf32>,
    } else {
    }
    return
  }
  func.func @transform_0(%arg0: i32, %arg1: i32) -> (i32, i32, i32) {
    %c0_i32 = arith.constant 0 : i32
    %c0_i32_0 = arith.constant 0 : i32
    return %arg0, %arg1, %c0_i32 : i32, i32, i32
  }
  func.func @transform_1(%arg0: i32, %arg1: i32) -> (i32, i32) {
    %c0_i32 = arith.constant 0 : i32
    %c0_i32_0 = arith.constant 0 : i32
    %c0_i32_1 = arith.constant 0 : i32
    return %c0_i32, %c0_i32_0 : i32, i32
  }
  func.func @transform_2(%arg0: i32, %arg1: i32) -> (i32, i32, i32) {
    %c0_i32 = arith.constant 0 : i32
    %c0_i32_0 = arith.constant 0 : i32
    %c0_i32_1 = arith.constant 0 : i32
    return %c0_i32, %arg1, %c0_i32_0 : i32, i32, i32
  }
  func.func @transform_3(%arg0: i32, %arg1: i32) -> (i32, i32) {
    %c0_i32 = arith.constant 0 : i32
    %c0_i32_0 = arith.constant 0 : i32
    %c0_i32_1 = arith.constant 0 : i32
    return %c0_i32, %c0_i32_0 : i32, i32
  }
  func.func @transform_4(%arg0: i32, %arg1: i32) -> (i32, i32, i32) {
    %c0_i32 = arith.constant 0 : i32
    %c0_i32_0 = arith.constant 0 : i32
    %c0_i32_1 = arith.constant 0 : i32
    return %arg0, %c0_i32, %c0_i32_0 : i32, i32, i32
  }
}

module attributes {stable_mosaic.version = 11 : i64} {
  func.func @fc_kernel(%arg0: i32, %arg1: memref<2x32xf32, #tpu.memory_space<vmem>>, %arg2: memref<3072x32xf32, #tpu.memory_space<vmem>>, %arg3: memref<1x3072xf32, #tpu.memory_space<vmem>>, %arg4: memref<2x3072xf32, #tpu.memory_space<vmem>>) attributes {dimension_semantics = [#tpu.dimension_semantics<parallel>], iteration_bounds = array<i64: 3>, scalar_prefetch = 0 : i64, scratch_operands = 0 : i64, tpu.core_type = #tpu.core_type<tc>, window_params = [{pipeline_mode = #tpu.pipeline_mode<synchronous>, transform_indices = @transform_0, window_bounds = array<i64: 2, 32>}, {transform_indices = @transform_1, window_bounds = array<i64: 3072, 32>}, {transform_indices = @transform_2, window_bounds = array<i64: 1, 3072>}, {transform_indices = @transform_3, window_bounds = array<i64: 2, 3072>}]} {
    %c0 = arith.constant 0 : index
    %c0_0 = arith.constant 0 : index
    %0 = vector.load %arg1[%c0, %c0_0] : memref<2x32xf32, #tpu.memory_space<vmem>>, vector<2x32xf32>
    %c0_1 = arith.constant 0 : index
    %c0_2 = arith.constant 0 : index
    %1 = vector.load %arg2[%c0_1, %c0_2] : memref<3072x32xf32, #tpu.memory_space<vmem>>, vector<3072x32xf32>
    %cst = arith.constant dense<0.000000e+00> : vector<2x3072xf32>
    %2 = tpu.matmul %0, %1, %cst {dimension_numbers = #tpu.dot_dimension_numbers<[1], [1], [0], [0], [0, 0, 1, 0], [], []>} : vector<2x32xf32>, vector<3072x32xf32>, vector<2x3072xf32> -> vector<2x3072xf32>
    %c0_3 = arith.constant 0 : index
    %c0_4 = arith.constant 0 : index
    %3 = vector.load %arg3[%c0_3, %c0_4] : memref<1x3072xf32, #tpu.memory_space<vmem>>, vector<1x3072xf32>
    %4 = vector.broadcast %3 : vector<1x3072xf32> to vector<2x3072xf32>
    %5 = arith.addf %2, %4 : vector<2x3072xf32>
    %c0_5 = arith.constant 0 : index
    %c0_6 = arith.constant 0 : index
    %6 = vector.load %arg4[%c0_5, %c0_6] : memref<2x3072xf32, #tpu.memory_space<vmem>>, vector<2x3072xf32>
    tpu.vector_store %arg4[%c0_5, %c0_6], %5 {strides = array<i32>} : memref<2x3072xf32, #tpu.memory_space<vmem>>, vector<2x3072xf32>,
    return
  }
  func.func @transform_0(%arg0: i32) -> (i32, i32) {
    %c0_i32 = arith.constant 0 : i32
    %c0_i32_0 = arith.constant 0 : i32
    %c0_i32_1 = arith.constant 0 : i32
    return %c0_i32, %c0_i32_0 : i32, i32
  }
  func.func @transform_1(%arg0: i32) -> (i32, i32) {
    %c0_i32 = arith.constant 0 : i32
    %c0_i32_0 = arith.constant 0 : i32
    return %arg0, %c0_i32 : i32, i32
  }
  func.func @transform_2(%arg0: i32) -> (i32, i32) {
    %c0_i32 = arith.constant 0 : i32
    %c0_i32_0 = arith.constant 0 : i32
    return %c0_i32, %arg0 : i32, i32
  }
  func.func @transform_3(%arg0: i32) -> (i32, i32) {
    %c0_i32 = arith.constant 0 : i32
    %c0_i32_0 = arith.constant 0 : i32
    return %c0_i32, %arg0 : i32, i32
  }
}

</mosaic_0001>

<bundles_post_ra>
// kernel: filter_predictor_s.2
= control target key start
LH: loop header
LB: loop body
LE: loop exit
PB: predicated region body
PF: predicated region fallthrough
CT: control target
= control target key end

     0   :  { %9 = vsyncpa [#allocation4], 0  ;;  %s1390_s0 = inlined_call_operand.vmem [shape: f32[2,64,256], index: 0, kind: input, shape index: {}]   ;;  %s1391_s1 = inlined_call_operand.hbm [shape: f32[9,256], index: 1, kind: input, shape index: {}]   ;;  %s1392_s2 = inlined_call_operand.vmem [shape: f32[9,64,32], index: 2, kind: input, shape index: {}]   ;;  %s1393_s3 = inlined_call_operand.hbm [shape: f32[1,32], index: 3, kind: input, shape index: {}]   ;;  %s1394_s4 = inlined_call_operand.vmem [shape: f32[2,1,32], index: 4, kind: output, shape index: {}]  }
   0x1   :  { %10 = vsyncpa [#allocation7], 0  ;;  %s1114_s15 = smov 0   ;;  %s1116_s16 = smov 0  }
   0x2   :  { %s1118_s17 = smov 0   ;;  %s1120_s18 = smov 0  }
   0x3   :  { %s1122_s19 = smov 0   ;;  %s1124_s20 = smov 0  }
   0x4   :  { %s1126_s21 = smov 0  }
   0x5 LB: > { %s850_s22 = sadd.s32 4294967295, %s1082_s21   ;;  %s25_s23 = sadd.s32 1, %s1074_s19  ;;  %s1082_s21 = sphi %s1126_s21, %s16_s21   ;;  %s1078_s20 = sphi %s1124_s20, %s1404_s20   ;;  %s1074_s19 = sphi %s1122_s19, %s1403_s19   ;;  %s1070_s18 = sphi %s1120_s18, %s1402_s18   ;;  %s1066_s17 = sphi %s1118_s17, %s1401_s17   ;;  %s1062_s16 = sphi %s1116_s16, %s1400_s16   ;;  %s1058_s15 = sphi %s1114_s15, %s1399_s15  }
   0x6   : > { %p26_p0 = scmp.ge.s32.totalorder %s25_s23, 4  ;;  %s28_s24 = sadd.s32 1, %s1078_s20 }
   0x7   : > { %s84_s25 = sadd.s32 1, %s1062_s16  ;;  %p91_p1 = scmp.ne.s32.totalorder %s1062_s16, %s1058_s15 }
   0x8   : > { %s1406_s23 = smov (%p26_p0, %s25_s23), 0  ;;  %s1408_s24 = smov (!%p26_p0, %s28_s24), %s1078_s20 }
   0x9   : > { %s81_s26 = ssub.s32 %s1074_s19, %s1406_s23  ;;  %p92_p2 = scmp.eq.s32.totalorder %s1082_s21, 0 }
   0xa   : > { %p30_p3 = scmp.ge.s32.totalorder %s1408_s24, 2  ;;  %p82_p4 = scmp.eq.s32.totalorder %s81_s26, 0 }
   0xb   : > { %p1161_p5 = por %p92_p2, %p91_p1  ;;  %p852_p6 = scmp.ge.s32.totalorder %s1082_s21, 1 }
   0xc   : > { %s1410_s24 = smov (%p30_p3, %s1408_s24), 0  ;;  %p155_p7 = scmp.lt.s32.totalorder %s1082_s21, 9 }
   0xd   : > { %s1169_s28 = scalar_select %p82_p4, %s1062_s16, %s84_s25  }
   0xe   : > { %p1172_p8 = scmp.eq.s32.totalorder %s850_s22, 0  ;;  %p1176_p9 = pnand %p852_p6, %p155_p7 }
   0xf   : > { %s1084_s5 = smov [#allocation3]   ;;  %s1085_s8 = smov [#allocation6]  }
  0x10   : > { %s167_s6 = sshll.u32 %s1084_s5, 4  ;;  %p896_p10 = pneg %p1176_p9  ;;  %s168_s6 = int_to_ptr.vmem [resolvable:$true] %s167_s6 }
  0x11   : > { %s181_s9 = sshll.u32 %s1085_s8, 4  ;;  %s979_s10 = scalar_lea.vmem %s168_s6, 512  ;;  %s182_s9 = int_to_ptr.vmem [resolvable:$true] %s181_s9 }
  0x12   : > { %p1184_p11 = pnand %p1172_p8, %p896_p10  ;;  %p980_p13 = scmp.ne.s32.totalorder %s168_s6, %s979_s10 }
  0x13   : > { %p987_p2 = scmp.lt.s32.totalorder %s168_s6, %s168_s6  ;;  %p988_p3 = scmp.lt.s32.totalorder %s979_s10, %s979_s10 }
  0x14   : > { %p970_p12 = pneg %p1184_p11 }
  0x15   : > { %p989_p4 = por %p988_p3, %p987_p2 }
  0x16   : > { %p982_p0 = pnand %p980_p13, %p970_p12 }
  0x18   : > { %p983_p1 = pneg %p982_p0 }
  0x1a   : > { %p990_p6 = pnand %p989_p4, %p983_p1 }
  0x1c   : > { %993 = shalt.err (!%p990_p6)
}
  0x1d   : > { %s1086_s11 = smov 256   ;;  %s1087_s12 = smov 16  }
  0x1e   : > { %899 = dma.hbm_to_vmem [thread:$0]  (!%p1184_p11), %s1391_s1, 512, %s168_s6, [#allocation4], %s1086_s11, %s1086_s11, %s1087_s12  }
  0x1f   : > { %s1005_s22 = scalar_lea.vmem %s182_s9, 16  ;;  %s1012_s25 = scalar_lea.vmem %s182_s9, 32 }
  0x20   : > { %p1006_p7 = scmp.ne.s32.totalorder %s182_s9, %s1005_s22  ;;  %p1013_p0 = scmp.lt.s32.totalorder %s182_s9, %s182_s9 }
  0x21   : > { %p1014_p2 = scmp.lt.s32.totalorder %s1012_s25, %s1005_s22 }
  0x22   : > { %p1008_p10 = pnand %p1006_p7, %p970_p12 }
  0x23   : > { %p1015_p1 = por %p1014_p2, %p1013_p0 }
  0x24   : > { %p1009_p13 = pneg %p1008_p10 }
  0x26   : > { %p1016_p3 = pnand %p1015_p1, %p1009_p13 }
  0x28   : > { %1019 = shalt.err (!%p1016_p3)
}
  0x29   : > { %902 = dma.hbm_to_vmem [thread:$0]  (!%p1184_p11), %s1393_s3, 16, %s182_s9, [#allocation7]  }
  0x2a   : > { %p855_p4 = scmp.ge.s32.totalorder %s1082_s21, 8 }
  0x2c   : > { %188 = sbr.rel (%p855_p4) target bundleno = 62 (0x3e), region = 24 }
  0x31   : > { %205 = sbr.rel (!%p1161_p5) target bundleno = 62 (0x3e), region = 32  ;;  %s207_s6 = sand.u32 (%p1161_p5), 1, %s1062_s16  }
  0x32   : > { %s885_s8 = sshll.u32 (%p1161_p5), %s1074_s19, 4  ;;  %s886_s10 = smul.u32 (%p1161_p5), 144, %s207_s6 }
  0x33   : > { %s1214_s13 = scalar_lea.vmem (%p1161_p5), %s1392_s2, %s885_s8 }
  0x34   : > { %v275_v0 = vld [vmem:[%s1214_s13] sm:$0xff] (%p1161_p5)  ;;  %v277_v1 = vld [vmem:[%s1214_s13 + $0x8] sm:$0xff] (%p1161_p5)  ;;  %s209_s27 = scalar_lea.vmem (%p1161_p5), [#allocation5], %s886_s10 }
  0x35   : > { %v279_v2 = vld [vmem:[%s1214_s13 + $0x40] sm:$0xff] (%p1161_p5)  ;;  %v281_v3 = vld [vmem:[%s1214_s13 + $0x48] sm:$0xff] (%p1161_p5)  ;;  %276 = vst [vmem:[%s209_s27] sm:$0xff] (%p1161_p5), %v275_v0  ;;  %278 = vst [vmem:[%s209_s27 + $0x8] sm:$0xff] (%p1161_p5), %v277_v1 }
  0x36   : > { %v283_v4 = vld [vmem:[%s1214_s13 + $0x80] sm:$0xff]  ;;  %v285_v5 = vld [vmem:[%s1214_s13 + $0x88] sm:$0xff]  ;;  %280 = vst [vmem:[%s209_s27 + $0x10] sm:$0xff] %v279_v2  ;;  %282 = vst [vmem:[%s209_s27 + $0x18] sm:$0xff] %v281_v3 }
  0x37   : > { %284 = vst [vmem:[%s209_s27 + $0x20] sm:$0xff] %v283_v4  ;;  %286 = vst [vmem:[%s209_s27 + $0x28] sm:$0xff] %v285_v5  ;;  %v287_v6 = vld [vmem:[%s1214_s13 + $0xc0] sm:$0xff]  ;;  %v289_v7 = vld [vmem:[%s1214_s13 + $0xc8] sm:$0xff] }
  0x38   : > { %v291_v8 = vld [vmem:[%s1214_s13 + $0x100] sm:$0xff]  ;;  %288 = vst [vmem:[%s209_s27 + $0x30] sm:$0xff] %v287_v6  ;;  %290 = vst [vmem:[%s209_s27 + $0x38] sm:$0xff] %v289_v7  ;;  %v293_v9 = vld [vmem:[%s1214_s13 + $0x108] sm:$0xff] }
  0x39   : > { %292 = vst [vmem:[%s209_s27 + $0x40] sm:$0xff] %v291_v8  ;;  %v295_v10 = vld [vmem:[%s1214_s13 + $0x140] sm:$0xff]  ;;  %v297_v11 = vld [vmem:[%s1214_s13 + $0x148] sm:$0xff]  ;;  %294 = vst [vmem:[%s209_s27 + $0x48] sm:$0xff] %v293_v9 }
  0x3a   : > { %296 = vst [vmem:[%s209_s27 + $0x50] sm:$0xff] %v295_v10  ;;  %298 = vst [vmem:[%s209_s27 + $0x58] sm:$0xff] %v297_v11  ;;  %v299_v12 = vld [vmem:[%s1214_s13 + $0x180] sm:$0xff]  ;;  %v301_v13 = vld [vmem:[%s1214_s13 + $0x188] sm:$0xff] }
  0x3b   : > { %v303_v14 = vld [vmem:[%s1214_s13 + $0x1c0] sm:$0xff]  ;;  %300 = vst [vmem:[%s209_s27 + $0x60] sm:$0xff] %v299_v12  ;;  %302 = vst [vmem:[%s209_s27 + $0x68] sm:$0xff] %v301_v13  ;;  %v305_v15 = vld [vmem:[%s1214_s13 + $0x1c8] sm:$0xff] }
  0x3c   : > { %304 = vst [vmem:[%s209_s27 + $0x70] sm:$0xff] %v303_v14  ;;  %v307_v16 = vld [vmem:[%s1214_s13 + $0x200] sm:$0xff]  ;;  %v309_v17 = vld [vmem:[%s1214_s13 + $0x208] sm:$0xff]  ;;  %306 = vst [vmem:[%s209_s27 + $0x78] sm:$0xff] %v305_v15 }
  0x3d   : > { %308 = vst [vmem:[%s209_s27 + $0x80] sm:$0xff] %v307_v16  ;;  %310 = vst [vmem:[%s209_s27 + $0x88] sm:$0xff] %v309_v17 }
  0x3e PF: > { %319 = sbr.rel (%p1176_p9) target bundleno = 301 (0x12d), region = 70 }
  0x43   : > { %1049 = dma.done.wait (%p1172_p8), [#allocation4], 512  }
  0x44   : > { %1051 = vsyncadd (%p1172_p8), [#allocation4], 4294966784  ;;  %s326_s7 = sand.u32 1, %s1058_s15  }
  0x45   : > { %s887_s9 = smul.u32 144, %s326_s7 }
  0x47   : > { %s1241_s14 = scalar_lea.vmem [#allocation5], %s887_s9 }
  0x48   : > { %1053 = dma.done.wait (%p1172_p8), [#allocation7], 16  }
  0x49   : > { %1055 = vsyncadd (%p1172_p8), [#allocation7], 4294967280  ;;  %s861_s30 = sshll.u32 %s1066_s17, 1  ;;  %p364_p5 = scmp.lt.s32.totalorder %s1070_s18, 1 }
  0x4a   : > { %p366_p9 = scmp.lt.s32.totalorder %s861_s30, 7  ;;  %p865_p8 = scmp.ne.s32.totalorder %s1066_s17, 0 }
  0x4b   : > { %s1412_s18 = smov (!%p364_p5, %s1070_s18), 1 }
  0x4c   : > { %s1414_s30 = smov (!%p366_p9, %s861_s30), 7  ;;  %s863_s15 = sshll.u32 %s1412_s18, 4 }
  0x4d   : > { %s377_s26 = scalar_lea.vmem %s1394_s4, %s1412_s18  ;;  %s862_s5 = sshll.u32 %s1414_s30, 1 }
  0x4e   : > { %s370_s6 = sadd.s32 %s863_s15, %s862_s5  ;;  %381 = sbr.rel (%p865_p8) target bundleno = 85 (0x55), region = 86 }
  0x4f   : > { %s864_s29 = sshll.u32 %s370_s6, 3 }
  0x50   : > { %s372_s11 = scalar_lea.vmem %s1390_s0, %s864_s29 }
  0x53   : > { %vm382_vm0 = vcmask 253952   ;;  %v1088_v18 = vmov 0.0  }
  0x54   : > { %383 = vst.msk [vmem:[#allocation2] sm:$0x1] %vm382_vm0, %v1088_v18 }
  0x55 PF: > { %v390_v19 = vlaneseq  ;;  %v426_v21 = vld [vmem:[#allocation3 + $0x1] ss:$8 sm:$0x3]  ;;  %v388_v22 = vld [vmem:[#allocation3] ss:$8 sm:$0x3] }
  0x56   : > { %v464_v25 = vld [vmem:[#allocation3 + $0x2] ss:$8 sm:$0x3]  ;;  %v1273_v32 = vld [vmem:[%s372_s11 + $0x10] sm:$0xff]  ;;  %v1275_v33 = vld [vmem:[%s372_s11 + $0x18] sm:$0xff]  ;;  %vm414_vm1 = vcmask 261120  }
  0x57   : > { %v391_v20 = vshrl.u32 %v390_v19, 7  ;;  %v1265_v26 = vld [vmem:[%s372_s11] sm:$0xff]  ;;  %v1267_v27 = vld [vmem:[%s372_s11 + $0x8] sm:$0xff]  ;;  %vm731_vm2 = vcmask 253952   ;;  %p882_p11 = scmp.ne.s32.totalorder %s1066_s17, 3 }
  0x58   : > { %v502_v36 = vld [vmem:[#allocation3 + $0x3] ss:$8 sm:$0x3]  ;;  %v540_v55 = vld [vmem:[#allocation3 + $0x4] ss:$8 sm:$0x3] }
  0x59   : > { %v1261_v23 = vsub.s32 0, %v391_v20  ;;  %v1263_v24 = vsub.s32 1, %v391_v20  ;;  %v578_v0 = vld [vmem:[#allocation3 + $0x5] ss:$8 sm:$0x3] }
  0x5a   : > { %v616_v6 = vld [vmem:[#allocation3 + $0x6] ss:$8 sm:$0x3]  ;;  %v654_v18 = vld [vmem:[#allocation3 + $0x7] ss:$8 sm:$0x3] }
  0x5b   : > { %v431_v28 = vrot.slane %v426_v21, %v1261_v23  ;;  %v435_v29 = vrot.slane %v426_v21, %v1263_v24  ;;  %v393_v30 = vrot.slane %v388_v22, %v1261_v23  ;;  %v397_v31 = vrot.slane %v388_v22, %v1263_v24 }
  0x5c   : > { %v469_v34 = vrot.slane %v464_v25, %v1261_v23  ;;  %v473_v35 = vrot.slane %v464_v25, %v1263_v24  ;;  %v507_v47 = vrot.slane %v502_v36, %v1261_v23  ;;  %v511_v48 = vrot.slane %v502_v36, %v1263_v24 }
  0x5d   : > { %v438_v37 = vmul.f32 %v431_v28, %v1265_v26  ;;  %v439_v38 = vmul.f32 %v435_v29, %v1267_v27  ;;  %v400_v39 = vmul.f32 %v393_v30, %v1265_v26  ;;  %v401_v40 = vmul.f32 %v397_v31, %v1267_v27 }
  0x5e   : > { %v440_v41 = vmul.f32 %v431_v28, %v1273_v32  ;;  %v441_v42 = vmul.f32 %v435_v29, %v1275_v33  ;;  %v402_v43 = vmul.f32 %v393_v30, %v1273_v32  ;;  %v403_v44 = vmul.f32 %v397_v31, %v1275_v33  ;;  %v692_v28 = vld [vmem:[#allocation3 + $0x10] ss:$8 sm:$0x3] }
  0x5f   : > { %v442_v45 = vadd.f32 %v439_v38, %v438_v37  ;;  %v404_v46 = vadd.f32 %v401_v40, %v400_v39  ;;  %v478_v50 = vmul.f32 %v469_v34, %v1273_v32  ;;  %v479_v51 = vmul.f32 %v473_v35, %v1275_v33 }
  0x60   : > { %v445_v49 = vadd.f32 %v441_v42, %v440_v41  ;;  %v407_v52 = vadd.f32 %v403_v44, %v402_v43  ;;  %v476_v53 = vmul.f32 %v469_v34, %v1265_v26  ;;  %v477_v54 = vmul.f32 %v473_v35, %v1267_v27 }
  0x61   : > { %443 = vadd.xlane.f32.xlu1 %v442_v45  ;;  %405 = vadd.xlane.f32.xlu0 %v404_v46  ;;  %v516_v56 = vmul.f32 %v507_v47, %v1273_v32  ;;  %v517_v57 = vmul.f32 %v511_v48, %v1275_v33  ;;  %v514_v58 = vmul.f32 %v507_v47, %v1265_v26 }
  0x62   : > { %v515_v59 = vmul.f32 %v511_v48, %v1267_v27  ;;  %v545_v60 = vrot.slane %v540_v55, %v1261_v23  ;;  %v483_v61 = vadd.f32 %v479_v51, %v478_v50  ;;  %v480_v62 = vadd.f32 %v477_v54, %v476_v53  ;;  %v410_v48 = vld [vmem:[%s1241_s14] sm:$0xff]  ;;  %v411_v50 = vld [vmem:[%s1241_s14 + $0x8] sm:$0xff] }
  0x63   : > { %v549_v63 = vrot.slane %v540_v55, %v1263_v24  ;;  %v521_v1 = vadd.f32 %v517_v57, %v516_v56  ;;  %v583_v4 = vrot.slane %v578_v0, %v1261_v23  ;;  %v587_v5 = vrot.slane %v578_v0, %v1263_v24  ;;  %v869_v56 = vld [vmem:[%s1241_s14 + $0x28] sm:$0xff]  ;;  %v868_v57 = vld [vmem:[%s1241_s14 + $0x20] sm:$0xff] }
  0x64   : > { %v518_v2 = vadd.f32 %v515_v59, %v514_v58  ;;  %v554_v3 = vmul.f32 %v545_v60, %v1273_v32  ;;  %v552_v8 = vmul.f32 %v545_v60, %v1265_v26  ;;  %v621_v10 = vrot.slane %v616_v6, %v1261_v23 }
  0x65   : > { %446 = vadd.xlane.f32.xlu1 %v445_v49  ;;  %408 = vadd.xlane.f32.xlu0 %v407_v52  ;;  %v555_v7 = vmul.f32 %v549_v63, %v1275_v33  ;;  %v553_v9 = vmul.f32 %v549_v63, %v1267_v27  ;;  %v592_v11 = vmul.f32 %v583_v4, %v1273_v32  ;;  %v867_v49 = vld [vmem:[%s1241_s14 + $0x18] sm:$0xff] }
  0x66   : > { %v593_v12 = vmul.f32 %v587_v5, %v1275_v33  ;;  %v590_v13 = vmul.f32 %v583_v4, %v1265_v26  ;;  %v625_v14 = vrot.slane %v616_v6, %v1263_v24  ;;  %v591_v17 = vmul.f32 %v587_v5, %v1267_v27  ;;  %v871_v6 = vld [vmem:[%s1241_s14 + $0x38] sm:$0xff] }
  0x67   : > { %v559_v15 = vadd.f32 %v555_v7, %v554_v3  ;;  %v556_v16 = vadd.f32 %v553_v9, %v552_v8  ;;  %v630_v19 = vmul.f32 %v621_v10, %v1273_v32  ;;  %v628_v21 = vmul.f32 %v621_v10, %v1265_v26  ;;  %v870_v7 = vld [vmem:[%s1241_s14 + $0x30] sm:$0xff] }
  0x68   : > { %v631_v20 = vmul.f32 %v625_v14, %v1275_v33  ;;  %v629_v22 = vmul.f32 %v625_v14, %v1267_v27  ;;  %v659_v25 = vrot.slane %v654_v18, %v1261_v23  ;;  %v597_v29 = vadd.f32 %v593_v12, %v592_v11 }
  0x69   : > { %484 = vadd.xlane.f32.xlu1 %v483_v61  ;;  %481 = vadd.xlane.f32.xlu0 %v480_v62  ;;  %v594_v30 = vadd.f32 %v591_v17, %v590_v13  ;;  %v663_v31 = vrot.slane %v654_v18, %v1263_v24  ;;  %v697_v34 = vrot.slane %v692_v28, %v1261_v23  ;;  %v873_v18 = vld [vmem:[%s1241_s14 + $0x48] sm:$0xff] }
  0x6a   : > { %v635_v35 = vadd.f32 %v631_v20, %v630_v19  ;;  %v632_v36 = vadd.f32 %v629_v22, %v628_v21  ;;  %v668_v37 = vmul.f32 %v659_v25, %v1273_v32  ;;  %v701_v38 = vrot.slane %v692_v28, %v1263_v24  ;;  %v872_v19 = vld [vmem:[%s1241_s14 + $0x40] sm:$0xff] }
  0x6b   : > { %v669_v39 = vmul.f32 %v663_v31, %v1275_v33  ;;  %v666_v40 = vmul.f32 %v659_v25, %v1265_v26  ;;  %v667_v41 = vmul.f32 %v663_v31, %v1267_v27  ;;  %v706_v42 = vmul.f32 %v697_v34, %v1273_v32  ;;  %v866_v32 = vld [vmem:[%s1241_s14 + $0x10] sm:$0xff] }
  0x6c   : > { %v707_v23 = vmul.f32 %v701_v38, %v1275_v33  ;;  %v704_v43 = vmul.f32 %v697_v34, %v1265_v26  ;;  %v705_v45 = vmul.f32 %v701_v38, %v1267_v27  ;;  %v874_v38 = vld [vmem:[%s1241_s14 + $0x50] sm:$0xff] }
  0x6d   : > { %522 = vadd.xlane.f32.xlu1 %v521_v1  ;;  %519 = vadd.xlane.f32.xlu0 %v518_v2  ;;  %v673_v24 = vadd.f32 %v669_v39, %v668_v37  ;;  %v670_v44 = vadd.f32 %v667_v41, %v666_v40  ;;  %v875_v37 = vld [vmem:[%s1241_s14 + $0x58] sm:$0xff] }
  0x6e   : > { %v711_v46 = vadd.f32 %v707_v23, %v706_v42  ;;  %v708_v47 = vadd.f32 %v705_v45, %v704_v43 }
  0x71   : > { %560 = vadd.xlane.f32.xlu1 %v559_v15  ;;  %557 = vadd.xlane.f32.xlu0 %v556_v16 }
  0x75   : > { %598 = vadd.xlane.f32.xlu1 %v597_v29  ;;  %595 = vadd.xlane.f32.xlu0 %v594_v30 }
  0x79   : > { %636 = vadd.xlane.f32.xlu1 %v635_v35  ;;  %633 = vadd.xlane.f32.xlu0 %v632_v36 }
  0x7d   : > { %674 = vadd.xlane.f32.xlu1 %v673_v24  ;;  %671 = vadd.xlane.f32.xlu0 %v670_v44 }
  0x81   : > { %712 = vadd.xlane.f32.xlu1 %v711_v46  ;;  %709 = vadd.xlane.f32.xlu0 %v708_v47 }
  0xea   : > { %v444_v33 = vpop.xlane.xlu1 %443  ;;  %v406_v26 = vpop.xlane.xlu0 %405 }
  0xeb   : > { %v451_v51 = vmul.f32 %v866_v32, %v444_v33  ;;  %v412_v52 = vmul.f32 %v410_v48, %v406_v26  ;;  %v877_v32 = vld [vmem:[%s1241_s14 + $0x68] sm:$0xff]  ;;  %v876_v33 = vld [vmem:[%s1241_s14 + $0x60] sm:$0xff] }
  0xed   : > { %v453_v58 = vsel %vm414_vm1, %v451_v51, 0.0  ;;  %v415_v59 = vsel %vm414_vm1, %v412_v52, 0.0 }
  0xee   : > { %v447_v53 = vpop.xlane.xlu1 %446  ;;  %v409_v54 = vpop.xlane.xlu0 %408 }
  0xef   : > { %v452_v27 = vmul.f32 %v867_v49, %v447_v53  ;;  %v413_v55 = vmul.f32 %v411_v50, %v409_v54 }
  0xf1   : > { %v454_v60 = vsel %vm414_vm1, %v452_v27, 0.0  ;;  %v416_v61 = vsel %vm414_vm1, %v413_v55, 0.0 }
  0xf2   : > { %v455_v62 = vadd.f32 %v454_v60, %v453_v58  ;;  %v417_v63 = vadd.f32 %v416_v61, %v415_v59  ;;  %v485_v0 = vpop.xlane.xlu1 %484  ;;  %v482_v1 = vpop.xlane.xlu0 %481  ;;  %v879_v60 = vld [vmem:[%s1241_s14 + $0x78] sm:$0xff]  ;;  %v878_v61 = vld [vmem:[%s1241_s14 + $0x70] sm:$0xff] }
  0xf3   : > { %v490_v2 = vmul.f32 %v869_v56, %v485_v0  ;;  %v489_v3 = vmul.f32 %v868_v57, %v482_v1 }
  0xf4   : > { %v456_v4 = vrot.slane %v455_v62, 4  ;;  %v418_v5 = vrot.slane %v417_v63, 4 }
  0xf5   : > { %v492_v8 = vsel %vm414_vm1, %v490_v2, 0.0  ;;  %v491_v9 = vsel %vm414_vm1, %v489_v3, 0.0 }
  0xf6   : > { %v493_v10 = vadd.f32 %v492_v8, %v491_v9  ;;  %v523_v11 = vpop.xlane.xlu1 %522  ;;  %v520_v12 = vpop.xlane.xlu0 %519  ;;  %v457_v15 = vadd.f32 %v456_v4, %v455_v62  ;;  %v419_v16 = vadd.f32 %v418_v5, %v417_v63 }
  0xf7   : > { %v528_v13 = vmul.f32 %v871_v6, %v523_v11  ;;  %v527_v14 = vmul.f32 %v870_v7, %v520_v12 }
  0xf8   : > { %v494_v17 = vrot.slane %v493_v10, 4  ;;  %v458_v34 = vrot.slane %v457_v15, 2  ;;  %v420_v35 = vrot.slane %v419_v16, 2 }
  0xf9   : > { %v530_v20 = vsel %vm414_vm1, %v528_v13, 0.0  ;;  %v529_v21 = vsel %vm414_vm1, %v527_v14, 0.0  ;;  %v881_v13 = vld [vmem:[%s1241_s14 + $0x88] sm:$0xff]  ;;  %v880_v14 = vld [vmem:[%s1241_s14 + $0x80] sm:$0xff] }
  0xfa   : > { %v531_v22 = vadd.f32 %v530_v20, %v529_v21  ;;  %v561_v25 = vpop.xlane.xlu1 %560  ;;  %v558_v28 = vpop.xlane.xlu0 %557  ;;  %v495_v29 = vadd.f32 %v494_v17, %v493_v10  ;;  %v459_v46 = vadd.f32 %v458_v34, %v457_v15  ;;  %v421_v47 = vadd.f32 %v420_v35, %v419_v16 }
  0xfb   : > { %v566_v30 = vmul.f32 %v873_v18, %v561_v25  ;;  %v565_v31 = vmul.f32 %v872_v19, %v558_v28 }
  0xfc   : > { %v532_v36 = vrot.slane %v531_v22, 4  ;;  %v496_v43 = vrot.slane %v495_v29, 2  ;;  %v460_v57 = vrot.slane %v459_v46, 1  ;;  %v422_v58 = vrot.slane %v421_v47, 1 }
  0xfd   : > { %v568_v39 = vsel %vm414_vm1, %v566_v30, 0.0  ;;  %v567_v40 = vsel %vm414_vm1, %v565_v31, 0.0 }
  0xfe   : > { %v533_v41 = vadd.f32 %v532_v36, %v531_v22  ;;  %v599_v42 = vpop.xlane.xlu1 %598  ;;  %v596_v23 = vpop.xlane.xlu0 %595  ;;  %v569_v24 = vadd.f32 %v568_v39, %v567_v40  ;;  %v497_v54 = vadd.f32 %v496_v43, %v495_v29  ;;  %v461_v9 = vadd.f32 %v460_v57, %v459_v46 }
  0xff   : > { %v604_v44 = vmul.f32 %v875_v37, %v599_v42  ;;  %v603_v45 = vmul.f32 %v874_v38, %v596_v23  ;;  %v423_v15 = vadd.f32 %v422_v58, %v421_v47  ;;  %v729_v58 = vld [vmem:[#allocation2] sm:$0x1] }
 0x100   : > { %v534_v48 = vrot.slane %v533_v41, 2  ;;  %v570_v26 = vrot.slane %v569_v24, 4  ;;  %v498_v6 = vrot.slane %v497_v54, 1 }
 0x101   : > { %v606_v49 = vsel %vm414_vm1, %v604_v44, 0.0  ;;  %v605_v50 = vsel %vm414_vm1, %v603_v45, 0.0  ;;  %v462_v36 = vadd.f32 %v461_v9, %v423_v15 }
 0x102   : > { %v607_v51 = vadd.f32 %v606_v49, %v605_v50  ;;  %v637_v52 = vpop.xlane.xlu1 %636  ;;  %v634_v53 = vpop.xlane.xlu0 %633  ;;  %v571_v27 = vadd.f32 %v570_v26, %v569_v24  ;;  %v535_v62 = vadd.f32 %v534_v48, %v533_v41  ;;  %v499_v28 = vadd.f32 %v498_v6, %v497_v54 }
 0x103   : > { %v642_v55 = vmul.f32 %v877_v32, %v637_v52  ;;  %v641_v56 = vmul.f32 %v876_v33, %v634_v53 }
 0x104   : > { %v608_v59 = vrot.slane %v607_v51, 4  ;;  %v572_v63 = vrot.slane %v571_v27, 2  ;;  %v536_v16 = vrot.slane %v535_v62, 1  ;;  %v500_v43 = vadd.f32 %v499_v28, %v462_v36 }
 0x105   : > { %v644_v0 = vsel %vm414_vm1, %v642_v55, 0.0  ;;  %v643_v1 = vsel %vm414_vm1, %v641_v56, 0.0 }
 0x106   : > { %v609_v2 = vadd.f32 %v608_v59, %v607_v51  ;;  %v645_v3 = vadd.f32 %v644_v0, %v643_v1  ;;  %v675_v4 = vpop.xlane.xlu1 %674  ;;  %v672_v5 = vpop.xlane.xlu0 %671  ;;  %v573_v10 = vadd.f32 %v572_v63, %v571_v27  ;;  %v537_v37 = vadd.f32 %v536_v16, %v535_v62 }
 0x107   : > { %v680_v7 = vmul.f32 %v879_v60, %v675_v4  ;;  %v679_v8 = vmul.f32 %v878_v61, %v672_v5 }
 0x108   : > { %v610_v11 = vrot.slane %v609_v2, 2  ;;  %v646_v12 = vrot.slane %v645_v3, 4  ;;  %v574_v31 = vrot.slane %v573_v10, 1  ;;  %v538_v47 = vadd.f32 %v537_v37, %v500_v43 }
 0x109   : > { %v682_v17 = vsel %vm414_vm1, %v680_v7, 0.0  ;;  %v681_v18 = vsel %vm414_vm1, %v679_v8, 0.0 }
 0x10a   : > { %v611_v19 = vadd.f32 %v610_v11, %v609_v2  ;;  %v647_v20 = vadd.f32 %v646_v12, %v645_v3  ;;  %v683_v21 = vadd.f32 %v682_v17, %v681_v18  ;;  %v713_v22 = vpop.xlane.xlu1 %712  ;;  %v710_v25 = vpop.xlane.xlu0 %709  ;;  %v575_v24 = vadd.f32 %v574_v31, %v573_v10 }
 0x10b   : > { %v718_v29 = vmul.f32 %v881_v13, %v713_v22  ;;  %v717_v30 = vmul.f32 %v880_v14, %v710_v25 }
 0x10c   : > { %v648_v34 = vrot.slane %v647_v20, 2  ;;  %v684_v35 = vrot.slane %v683_v21, 4  ;;  %v612_v40 = vrot.slane %v611_v19, 1  ;;  %v576_v26 = vadd.f32 %v575_v24, %v538_v47 }
 0x10d   : > { %v720_v38 = vsel %vm414_vm1, %v718_v29, 0.0  ;;  %v719_v39 = vsel %vm414_vm1, %v717_v30, 0.0 }
 0x10e   : > { %v649_v41 = vadd.f32 %v648_v34, %v647_v20  ;;  %v685_v42 = vadd.f32 %v684_v35, %v683_v21  ;;  %v721_v23 = vadd.f32 %v720_v38, %v719_v39  ;;  %v613_v32 = vadd.f32 %v612_v40, %v611_v19 }
 0x110   : > { %v650_v44 = vrot.slane %v649_v41, 1  ;;  %v686_v45 = vrot.slane %v685_v42, 2  ;;  %v722_v46 = vrot.slane %v721_v23, 4  ;;  %v614_v52 = vadd.f32 %v613_v32, %v576_v26 }
 0x112   : > { %v687_v33 = vadd.f32 %v686_v45, %v685_v42  ;;  %v723_v48 = vadd.f32 %v722_v46, %v721_v23  ;;  %v651_v49 = vadd.f32 %v650_v44, %v649_v41 }
 0x114   : > { %v688_v50 = vrot.slane %v687_v33, 1  ;;  %v724_v51 = vrot.slane %v723_v48, 2  ;;  %v652_v27 = vadd.f32 %v651_v49, %v614_v52 }
 0x116   : > { %v689_v53 = vadd.f32 %v688_v50, %v687_v33  ;;  %v725_v54 = vadd.f32 %v724_v51, %v723_v48 }
 0x118   : > { %v726_v55 = vrot.slane %v725_v54, 1  ;;  %v690_v56 = vadd.f32 %v689_v53, %v652_v27 }
 0x11a   : > { %v727_v57 = vadd.f32 %v726_v55, %v725_v54 }
 0x11c   : > { %v728_v59 = vadd.f32 %v727_v57, %v690_v56  ;;  %736 = sbr.rel (%p882_p11) target bundleno = 301 (0x12d), region = 90 }
 0x11e   : > { %v730_v60 = vadd.f32 %v729_v58, %v728_v59 }
 0x120   : > { %732 = vst.msk [vmem:[#allocation2] sm:$0x1] %vm731_vm2, %v730_v60 }
 0x121   : > { %v739_v62 = vld [vmem:[#allocation6] sm:$0x1] }
 0x127   : > { %v737_v61 = vld [vmem:[#allocation2] sm:$0x1] }
 0x128   : > { %v738_v63 = vmul.f32 0.00390625, %v737_v61 }
 0x12a   : > { %v740_v0 = vadd.f32 %v739_v62, %v738_v63 }
 0x12c   : > { %741 = vst.msk [vmem:[%s377_s26] sm:$0x1] %vm731_vm2, %v740_v0 }
 0x12d PF: > { %s16_s21 = sadd.s32 1, %s1082_s21   ;;  %s1399_s15 = smov %s1062_s16 }
 0x12e   : > { %p13_p12 = scmp.ge.s32.totalorder %s16_s21, 10   ;;  %s1400_s16 = smov %s1169_s28 }
 0x12f   : > { %s1401_s17 = smov %s1074_s19  ;;  %s1402_s18 = smov %s1078_s20 }
 0x130   : > { %s1403_s19 = smov %s1406_s23  ;;  %s1404_s20 = smov %s1410_s24 }
 0x131   :  { %15 = sbr.rel (!%p13_p12) target bundleno = 5 (0x5), region = 145 }
 0x136   :  { %759 = vsyncpa [#allocation4], 1 }
 0x137   :  { %761 = vsyncpa [#allocation4 + $0x1], 1 }
 0x138   :  { %762 = vsyncpa [#allocation7], 1 }

// kernel: filter_predictor_s.3
= control target key start
LH: loop header
LB: loop body
LE: loop exit
PB: predicated region body
PF: predicated region fallthrough
CT: control target
= control target key end

     0   :  { %s3767_s12 = smov 0   ;;  %s4711_s0 = inlined_call_operand.vmem [shape: f32[2,32], index: 0, kind: input, shape index: {}]   ;;  %s4712_s1 = inlined_call_operand.vmem [shape: f32[9216,32], index: 1, kind: input, shape index: {}]   ;;  %s4713_s2 = inlined_call_operand.vmem [shape: f32[1,9216], index: 2, kind: input, shape index: {}]   ;;  %s4714_s3 = inlined_call_operand.vmem [shape: f32[2,9216], index: 3, kind: output, shape index: {}]  }
   0x1 LB: > { %s2915_s13 = sadd.s32 4294967295, %s3744_s12   ;;  %p2919_p0 = scmp.ge.s32.totalorder %s3744_s12, 1  ;;  %s3744_s12 = sphi %s3767_s12, %s13_s12  }
   0x2   : > { %p148_p1 = scmp.lt.s32.totalorder %s3744_s12, 4 }
   0x4   : > { %p149_p2 = pnand %p2919_p0, %p148_p1 }
   0x5   : > { %s176_s14 = smul.u32 (!%p149_p2), 384, %s2915_s13 }
   0x6   : > { %152 = sbr.rel (%p149_p2) target bundleno = 605 (0x25d), region = 32 }
   0x7   : > { %p177_p3 = scmp.lt.s32.totalorder (!%p149_p2), %s176_s14, 1151  ;;  %s182_s21 = smul.u32 (!%p149_p2), 24, %s2915_s13 }
   0x9   : > { %p183_p4 = scmp.lt.s32.totalorder (!%p149_p2), %s182_s21, 71 }
   0xb   : > { %vm704_vm0 = vcmask 261120   ;;  %v3780_v0 = vld [vmem:[%s4711_s0] sm:$0x3]  ;;  %s4716_s14 = smov (!%p177_p3, %s176_s14), 1151  ;;  %s4718_s21 = smov (!%p183_p4, %s182_s21), 71 }
   0xc   : > { %3352 = vmatprep.mubr.msk.f32.mxu0 %vm704_vm0, %v3780_v0  ;;  %3386 = vmatprep.mubr.msk.f32.mxu1 %vm704_vm0, %v3780_v0  ;;  %s2920_s17 = sshll.u32 %s4716_s14, 3  ;;  %s4329_s24 = scalar_lea.vmem %s4713_s2, %s4718_s21 }
   0xd   : > { %s3789_s20 = scalar_lea.vmem %s4712_s1, %s2920_s17  ;;  %s2921_s27 = sshll.u32 %s4718_s21, 1 }
   0xe   : > { %v225_v1 = vld [vmem:[%s3789_s20 + $0xf8] sm:$0xff]  ;;  %v224_v5 = vld [vmem:[%s3789_s20 + $0xf0] sm:$0xff]  ;;  %v223_v9 = vld [vmem:[%s3789_s20 + $0xe8] sm:$0xff]  ;;  %s4408_s30 = scalar_lea.vmem %s4714_s3, %s2921_s27 }
   0xf   : > { %v257_v2 = vld [vmem:[%s3789_s20 + $0x1f8] sm:$0xff]  ;;  %3320 = vmatprep.subr.msk.mxu0 %vm704_vm0, %v225_v1  ;;  %v256_v6 = vld [vmem:[%s3789_s20 + $0x1f0] sm:$0xff]  ;;  %v255_v10 = vld [vmem:[%s3789_s20 + $0x1e8] sm:$0xff] }
  0x10   : > { %v209_v3 = vld [vmem:[%s3789_s20 + $0x78] sm:$0xff]  ;;  %3354 = vmatprep.subr.msk.mxu1 %vm704_vm0, %v257_v2  ;;  %v208_v7 = vld [vmem:[%s3789_s20 + $0x70] sm:$0xff]  ;;  %v207_v11 = vld [vmem:[%s3789_s20 + $0x68] sm:$0xff] }
  0x11   : > { %v241_v4 = vld [vmem:[%s3789_s20 + $0x178] sm:$0xff]  ;;  %3321 = vmatpush3.xpose.msk.msra.mxu0 %vm704_vm0, %v209_v3  ;;  %v240_v8 = vld [vmem:[%s3789_s20 + $0x170] sm:$0xff]  ;;  %v239_v12 = vld [vmem:[%s3789_s20 + $0x168] sm:$0xff] }
  0x12   : > { %3355 = vmatpush3.xpose.msk.msra.mxu1 %vm704_vm0, %v241_v4  ;;  %3322 = vmatprep.subr.msk.mxu0 %vm704_vm0, %v224_v5  ;;  %v222_v13 = vld [vmem:[%s3789_s20 + $0xe0] sm:$0xff]  ;;  %v221_v17 = vld [vmem:[%s3789_s20 + $0xd8] sm:$0xff]  ;;  %v220_v21 = vld [vmem:[%s3789_s20 + $0xd0] sm:$0xff] }
  0x13   : > { %3356 = vmatprep.subr.msk.mxu1 %vm704_vm0, %v256_v6  ;;  %v254_v14 = vld [vmem:[%s3789_s20 + $0x1e0] sm:$0xff]  ;;  %v253_v18 = vld [vmem:[%s3789_s20 + $0x1d8] sm:$0xff]  ;;  %v252_v22 = vld [vmem:[%s3789_s20 + $0x1d0] sm:$0xff] }
  0x14   : > { %v206_v15 = vld [vmem:[%s3789_s20 + $0x60] sm:$0xff]  ;;  %v205_v19 = vld [vmem:[%s3789_s20 + $0x58] sm:$0xff]  ;;  %v204_v23 = vld [vmem:[%s3789_s20 + $0x50] sm:$0xff] }
  0x15   : > { %3323 = vmatpush3.xpose.msk.msra.mxu0 %vm704_vm0, %v208_v7  ;;  %v238_v16 = vld [vmem:[%s3789_s20 + $0x160] sm:$0xff]  ;;  %v237_v20 = vld [vmem:[%s3789_s20 + $0x158] sm:$0xff]  ;;  %v236_v24 = vld [vmem:[%s3789_s20 + $0x150] sm:$0xff] }
  0x16   : > { %3357 = vmatpush3.xpose.msk.msra.mxu1 %vm704_vm0, %v240_v8  ;;  %3324 = vmatprep.subr.msk.mxu0 %vm704_vm0, %v223_v9  ;;  %v219_v25 = vld [vmem:[%s3789_s20 + $0xc8] sm:$0xff]  ;;  %v218_v29 = vld [vmem:[%s3789_s20 + $0xc0] sm:$0xff]  ;;  %v217_v33 = vld [vmem:[%s3789_s20 + $0xb8] sm:$0xff] }
  0x17   : > { %3358 = vmatprep.subr.msk.mxu1 %vm704_vm0, %v255_v10  ;;  %v251_v26 = vld [vmem:[%s3789_s20 + $0x1c8] sm:$0xff]  ;;  %v250_v30 = vld [vmem:[%s3789_s20 + $0x1c0] sm:$0xff]  ;;  %v249_v34 = vld [vmem:[%s3789_s20 + $0x1b8] sm:$0xff] }
  0x18   : > { %v203_v27 = vld [vmem:[%s3789_s20 + $0x48] sm:$0xff]  ;;  %v202_v31 = vld [vmem:[%s3789_s20 + $0x40] sm:$0xff]  ;;  %v201_v35 = vld [vmem:[%s3789_s20 + $0x38] sm:$0xff] }
  0x19   : > { %3325 = vmatpush3.xpose.msk.msra.mxu0 %vm704_vm0, %v207_v11  ;;  %v235_v28 = vld [vmem:[%s3789_s20 + $0x148] sm:$0xff]  ;;  %v234_v32 = vld [vmem:[%s3789_s20 + $0x140] sm:$0xff]  ;;  %v233_v36 = vld [vmem:[%s3789_s20 + $0x138] sm:$0xff] }
  0x1a   : > { %3359 = vmatpush3.xpose.msk.msra.mxu1 %vm704_vm0, %v239_v12  ;;  %3326 = vmatprep.subr.msk.mxu0 %vm704_vm0, %v222_v13  ;;  %v216_v37 = vld [vmem:[%s3789_s20 + $0xb0] sm:$0xff]  ;;  %v215_v41 = vld [vmem:[%s3789_s20 + $0xa8] sm:$0xff]  ;;  %v214_v45 = vld [vmem:[%s3789_s20 + $0xa0] sm:$0xff] }
  0x1b   : > { %3360 = vmatprep.subr.msk.mxu1 %vm704_vm0, %v254_v14  ;;  %v248_v38 = vld [vmem:[%s3789_s20 + $0x1b0] sm:$0xff]  ;;  %v247_v42 = vld [vmem:[%s3789_s20 + $0x1a8] sm:$0xff]  ;;  %v246_v46 = vld [vmem:[%s3789_s20 + $0x1a0] sm:$0xff] }
  0x1c   : > { %v200_v39 = vld [vmem:[%s3789_s20 + $0x30] sm:$0xff]  ;;  %v199_v43 = vld [vmem:[%s3789_s20 + $0x28] sm:$0xff]  ;;  %v198_v47 = vld [vmem:[%s3789_s20 + $0x20] sm:$0xff] }
  0x1d   : > { %3327 = vmatpush3.xpose.msk.msra.mxu0 %vm704_vm0, %v206_v15  ;;  %v232_v40 = vld [vmem:[%s3789_s20 + $0x130] sm:$0xff]  ;;  %v231_v44 = vld [vmem:[%s3789_s20 + $0x128] sm:$0xff]  ;;  %v230_v48 = vld [vmem:[%s3789_s20 + $0x120] sm:$0xff] }
  0x1e   : > { %3361 = vmatpush3.xpose.msk.msra.mxu1 %vm704_vm0, %v238_v16  ;;  %3328 = vmatprep.subr.msk.mxu0 %vm704_vm0, %v221_v17  ;;  %v213_v49 = vld [vmem:[%s3789_s20 + $0x98] sm:$0xff]  ;;  %v212_v53 = vld [vmem:[%s3789_s20 + $0x90] sm:$0xff]  ;;  %v211_v57 = vld [vmem:[%s3789_s20 + $0x88] sm:$0xff] }
  0x1f   : > { %3362 = vmatprep.subr.msk.mxu1 %vm704_vm0, %v253_v18  ;;  %v245_v50 = vld [vmem:[%s3789_s20 + $0x198] sm:$0xff]  ;;  %v244_v54 = vld [vmem:[%s3789_s20 + $0x190] sm:$0xff]  ;;  %v243_v58 = vld [vmem:[%s3789_s20 + $0x188] sm:$0xff] }
  0x20   : > { %v197_v51 = vld [vmem:[%s3789_s20 + $0x18] sm:$0xff]  ;;  %v196_v55 = vld [vmem:[%s3789_s20 + $0x10] sm:$0xff]  ;;  %v195_v59 = vld [vmem:[%s3789_s20 + $0x8] sm:$0xff] }
  0x21   : > { %3329 = vmatpush3.xpose.msk.msra.mxu0 %vm704_vm0, %v205_v19  ;;  %v229_v52 = vld [vmem:[%s3789_s20 + $0x118] sm:$0xff]  ;;  %v228_v56 = vld [vmem:[%s3789_s20 + $0x110] sm:$0xff]  ;;  %v227_v60 = vld [vmem:[%s3789_s20 + $0x108] sm:$0xff] }
  0x22   : > { %3363 = vmatpush3.xpose.msk.msra.mxu1 %vm704_vm0, %v237_v20  ;;  %3330 = vmatprep.subr.msk.mxu0 %vm704_vm0, %v220_v21  ;;  %v210_v61 = vld [vmem:[%s3789_s20 + $0x80] sm:$0xff]  ;;  %v289_v2 = vld [vmem:[%s3789_s20 + $0x2f8] sm:$0xff]  ;;  %v288_v6 = vld [vmem:[%s3789_s20 + $0x2f0] sm:$0xff] }
  0x23   : > { %3364 = vmatprep.subr.msk.mxu1 %vm704_vm0, %v252_v22  ;;  %v242_v62 = vld [vmem:[%s3789_s20 + $0x180] sm:$0xff]  ;;  %v321_v3 = vld [vmem:[%s3789_s20 + $0x3f8] sm:$0xff]  ;;  %v320_v7 = vld [vmem:[%s3789_s20 + $0x3f0] sm:$0xff] }
  0x24   : > { %v194_v63 = vld [vmem:[%s3789_s20] sm:$0xff]  ;;  %v273_v4 = vld [vmem:[%s3789_s20 + $0x278] sm:$0xff]  ;;  %v272_v8 = vld [vmem:[%s3789_s20 + $0x270] sm:$0xff] }
  0x25   : > { %3331 = vmatpush3.xpose.msk.msra.mxu0 %vm704_vm0, %v204_v23  ;;  %v226_v1 = vld [vmem:[%s3789_s20 + $0x100] sm:$0xff]  ;;  %v305_v5 = vld [vmem:[%s3789_s20 + $0x378] sm:$0xff]  ;;  %v304_v9 = vld [vmem:[%s3789_s20 + $0x370] sm:$0xff] }
  0x26   : > { %3365 = vmatpush3.xpose.msk.msra.mxu1 %vm704_vm0, %v236_v24  ;;  %3332 = vmatprep.subr.msk.mxu0 %vm704_vm0, %v219_v25  ;;  %v287_v10 = vld [vmem:[%s3789_s20 + $0x2e8] sm:$0xff]  ;;  %v286_v14 = vld [vmem:[%s3789_s20 + $0x2e0] sm:$0xff]  ;;  %v285_v18 = vld [vmem:[%s3789_s20 + $0x2d8] sm:$0xff] }
  0x27   : > { %3366 = vmatprep.subr.msk.mxu1 %vm704_vm0, %v251_v26  ;;  %v319_v11 = vld [vmem:[%s3789_s20 + $0x3e8] sm:$0xff]  ;;  %v318_v15 = vld [vmem:[%s3789_s20 + $0x3e0] sm:$0xff]  ;;  %v317_v19 = vld [vmem:[%s3789_s20 + $0x3d8] sm:$0xff] }
  0x28   : > { %v271_v12 = vld [vmem:[%s3789_s20 + $0x268] sm:$0xff]  ;;  %v270_v16 = vld [vmem:[%s3789_s20 + $0x260] sm:$0xff]  ;;  %v269_v20 = vld [vmem:[%s3789_s20 + $0x258] sm:$0xff] }
  0x29   : > { %3333 = vmatpush3.xpose.msk.msra.mxu0 %vm704_vm0, %v203_v27  ;;  %v303_v13 = vld [vmem:[%s3789_s20 + $0x368] sm:$0xff]  ;;  %v302_v17 = vld [vmem:[%s3789_s20 + $0x360] sm:$0xff]  ;;  %v301_v21 = vld [vmem:[%s3789_s20 + $0x358] sm:$0xff] }
  0x2a   : > { %3367 = vmatpush3.xpose.msk.msra.mxu1 %vm704_vm0, %v235_v28  ;;  %3334 = vmatprep.subr.msk.mxu0 %vm704_vm0, %v218_v29  ;;  %v284_v22 = vld [vmem:[%s3789_s20 + $0x2d0] sm:$0xff]  ;;  %v283_v26 = vld [vmem:[%s3789_s20 + $0x2c8] sm:$0xff] }
  0x2b   : > { %3368 = vmatprep.subr.msk.mxu1 %vm704_vm0, %v250_v30  ;;  %v316_v23 = vld [vmem:[%s3789_s20 + $0x3d0] sm:$0xff]  ;;  %v315_v27 = vld [vmem:[%s3789_s20 + $0x3c8] sm:$0xff]  ;;  %v282_v30 = vld [vmem:[%s3789_s20 + $0x2c0] sm:$0xff] }
  0x2c   : > { %v268_v24 = vld [vmem:[%s3789_s20 + $0x250] sm:$0xff]  ;;  %v267_v28 = vld [vmem:[%s3789_s20 + $0x248] sm:$0xff] }
  0x2d   : > { %3335 = vmatpush3.xpose.msk.msra.mxu0 %vm704_vm0, %v202_v31  ;;  %v300_v25 = vld [vmem:[%s3789_s20 + $0x350] sm:$0xff]  ;;  %v299_v29 = vld [vmem:[%s3789_s20 + $0x348] sm:$0xff]  ;;  %v314_v31 = vld [vmem:[%s3789_s20 + $0x3c0] sm:$0xff] }
  0x2e   : > { %3369 = vmatpush3.xpose.msk.msra.mxu1 %vm704_vm0, %v234_v32  ;;  %3336 = vmatprep.subr.msk.mxu0 %vm704_vm0, %v217_v33  ;;  %v266_v32 = vld [vmem:[%s3789_s20 + $0x240] sm:$0xff] }
  0x2f   : > { %3370 = vmatprep.subr.msk.mxu1 %vm704_vm0, %v249_v34  ;;  %v298_v33 = vld [vmem:[%s3789_s20 + $0x340] sm:$0xff]  ;;  %v281_v34 = vld [vmem:[%s3789_s20 + $0x2b8] sm:$0xff] }
  0x31   : > { %3337 = vmatpush3.xpose.msk.msra.mxu0 %vm704_vm0, %v201_v35  ;;  %v313_v35 = vld [vmem:[%s3789_s20 + $0x3b8] sm:$0xff] }
  0x32   : > { %3371 = vmatpush3.xpose.msk.msra.mxu1 %vm704_vm0, %v233_v36  ;;  %3338 = vmatprep.subr.msk.mxu0 %vm704_vm0, %v216_v37  ;;  %v265_v36 = vld [vmem:[%s3789_s20 + $0x238] sm:$0xff] }
  0x33   : > { %3372 = vmatprep.subr.msk.mxu1 %vm704_vm0, %v248_v38  ;;  %v297_v37 = vld [vmem:[%s3789_s20 + $0x338] sm:$0xff]  ;;  %v280_v38 = vld [vmem:[%s3789_s20 + $0x2b0] sm:$0xff] }
  0x35   : > { %3339 = vmatpush3.xpose.msk.msra.mxu0 %vm704_vm0, %v200_v39  ;;  %v312_v39 = vld [vmem:[%s3789_s20 + $0x3b0] sm:$0xff] }
  0x36   : > { %3373 = vmatpush3.xpose.msk.msra.mxu1 %vm704_vm0, %v232_v40  ;;  %3340 = vmatprep.subr.msk.mxu0 %vm704_vm0, %v215_v41  ;;  %v264_v40 = vld [vmem:[%s3789_s20 + $0x230] sm:$0xff] }
  0x37   : > { %3374 = vmatprep.subr.msk.mxu1 %vm704_vm0, %v247_v42  ;;  %v296_v41 = vld [vmem:[%s3789_s20 + $0x330] sm:$0xff]  ;;  %v279_v42 = vld [vmem:[%s3789_s20 + $0x2a8] sm:$0xff] }
  0x39   : > { %3341 = vmatpush3.xpose.msk.msra.mxu0 %vm704_vm0, %v199_v43  ;;  %v311_v43 = vld [vmem:[%s3789_s20 + $0x3a8] sm:$0xff] }
  0x3a   : > { %3375 = vmatpush3.xpose.msk.msra.mxu1 %vm704_vm0, %v231_v44  ;;  %3342 = vmatprep.subr.msk.mxu0 %vm704_vm0, %v214_v45  ;;  %v263_v44 = vld [vmem:[%s3789_s20 + $0x228] sm:$0xff] }
  0x3b   : > { %3376 = vmatprep.subr.msk.mxu1 %vm704_vm0, %v246_v46  ;;  %v295_v45 = vld [vmem:[%s3789_s20 + $0x328] sm:$0xff]  ;;  %v278_v46 = vld [vmem:[%s3789_s20 + $0x2a0] sm:$0xff] }
  0x3d   : > { %3343 = vmatpush3.xpose.msk.msra.mxu0 %vm704_vm0, %v198_v47  ;;  %v310_v47 = vld [vmem:[%s3789_s20 + $0x3a0] sm:$0xff] }
  0x3e   : > { %3377 = vmatpush3.xpose.msk.msra.mxu1 %vm704_vm0, %v230_v48  ;;  %3344 = vmatprep.subr.msk.mxu0 %vm704_vm0, %v213_v49  ;;  %v262_v48 = vld [vmem:[%s3789_s20 + $0x220] sm:$0xff] }
  0x3f   : > { %3378 = vmatprep.subr.msk.mxu1 %vm704_vm0, %v245_v50  ;;  %v294_v49 = vld [vmem:[%s3789_s20 + $0x320] sm:$0xff]  ;;  %v277_v50 = vld [vmem:[%s3789_s20 + $0x298] sm:$0xff] }
  0x41   : > { %3345 = vmatpush3.xpose.msk.msra.mxu0 %vm704_vm0, %v197_v51  ;;  %v309_v51 = vld [vmem:[%s3789_s20 + $0x398] sm:$0xff] }
  0x42   : > { %3379 = vmatpush3.xpose.msk.msra.mxu1 %vm704_vm0, %v229_v52  ;;  %3346 = vmatprep.subr.msk.mxu0 %vm704_vm0, %v212_v53  ;;  %v261_v52 = vld [vmem:[%s3789_s20 + $0x218] sm:$0xff] }
  0x43   : > { %3380 = vmatprep.subr.msk.mxu1 %vm704_vm0, %v244_v54  ;;  %v293_v53 = vld [vmem:[%s3789_s20 + $0x318] sm:$0xff]  ;;  %v276_v54 = vld [vmem:[%s3789_s20 + $0x290] sm:$0xff] }
  0x45   : > { %3347 = vmatpush3.xpose.msk.msra.mxu0 %vm704_vm0, %v196_v55  ;;  %v308_v55 = vld [vmem:[%s3789_s20 + $0x390] sm:$0xff] }
  0x46   : > { %3381 = vmatpush3.xpose.msk.msra.mxu1 %vm704_vm0, %v228_v56  ;;  %3348 = vmatprep.subr.msk.mxu0 %vm704_vm0, %v211_v57  ;;  %v260_v56 = vld [vmem:[%s3789_s20 + $0x210] sm:$0xff] }
  0x47   : > { %3382 = vmatprep.subr.msk.mxu1 %vm704_vm0, %v243_v58  ;;  %v292_v57 = vld [vmem:[%s3789_s20 + $0x310] sm:$0xff]  ;;  %v275_v58 = vld [vmem:[%s3789_s20 + $0x288] sm:$0xff] }
  0x49   : > { %3349 = vmatpush3.xpose.msk.msra.mxu0 %vm704_vm0, %v195_v59  ;;  %v307_v59 = vld [vmem:[%s3789_s20 + $0x388] sm:$0xff] }
  0x4a   : > { %3383 = vmatpush3.xpose.msk.msra.mxu1 %vm704_vm0, %v227_v60  ;;  %3350 = vmatprep.subr.msk.mxu0 %vm704_vm0, %v210_v61  ;;  %v259_v60 = vld [vmem:[%s3789_s20 + $0x208] sm:$0xff] }
  0x4b   : > { %3384 = vmatprep.subr.msk.mxu1 %vm704_vm0, %v242_v62  ;;  %v291_v61 = vld [vmem:[%s3789_s20 + $0x308] sm:$0xff]  ;;  %v274_v62 = vld [vmem:[%s3789_s20 + $0x280] sm:$0xff] }
  0x4d   : > { %3351 = vmatpush3.xpose.msk.msra.mxu0 %vm704_vm0, %v194_v63  ;;  %v306_v63 = vld [vmem:[%s3789_s20 + $0x380] sm:$0xff] }
  0x4e   : > { %3385 = vmatpush3.xpose.msk.msra.mxu1 %vm704_vm0, %v226_v1  ;;  %3388 = vmatprep.subr.msk.mxu0 %vm704_vm0, %v289_v2  ;;  %v258_v1 = vld [vmem:[%s3789_s20 + $0x200] sm:$0xff] }
  0x4f   : > { %3422 = vmatprep.subr.msk.mxu1 %vm704_vm0, %v321_v3  ;;  %v290_v2 = vld [vmem:[%s3789_s20 + $0x300] sm:$0xff]  ;;  %v353_v3 = vld [vmem:[%s3789_s20 + $0x4f8] sm:$0xff] }
  0x50   : > { %3353 = vmatmul.mubr.msk.f32.vlgmr.msra.gmra.mxu0 %vm704_vm0, %v3780_v0 }
  0x51   : > { %3387 = vmatmul.mubr.msk.f32.vlgmr.msra.gmra.mxu1 %vm704_vm0, %v3780_v0  ;;  %3389 = vmatpush3.xpose.msk.msra.mxu0 %vm704_vm0, %v273_v4  ;;  %v385_v4 = vld [vmem:[%s3789_s20 + $0x5f8] sm:$0xff] }
  0x52   : > { %3423 = vmatpush3.xpose.msk.msra.mxu1 %vm704_vm0, %v305_v5  ;;  %3390 = vmatprep.subr.msk.mxu0 %vm704_vm0, %v288_v6  ;;  %v337_v5 = vld [vmem:[%s3789_s20 + $0x478] sm:$0xff] }
  0x53   : > { %3424 = vmatprep.subr.msk.mxu1 %vm704_vm0, %v320_v7  ;;  %3420 = vmatprep.mubr.msk.f32.mxu0 %vm704_vm0, %v3780_v0  ;;  %v369_v6 = vld [vmem:[%s3789_s20 + $0x578] sm:$0xff]  ;;  %v352_v7 = vld [vmem:[%s3789_s20 + $0x4f0] sm:$0xff] }
  0x54   : > { %3454 = vmatprep.mubr.msk.f32.mxu1 %vm704_vm0, %v3780_v0 }
  0x55   : > { %3391 = vmatpush3.xpose.msk.msra.mxu0 %vm704_vm0, %v272_v8  ;;  %v384_v8 = vld [vmem:[%s3789_s20 + $0x5f0] sm:$0xff] }
  0x56   : > { %3425 = vmatpush3.xpose.msk.msra.mxu1 %vm704_vm0, %v304_v9  ;;  %3392 = vmatprep.subr.msk.mxu0 %vm704_vm0, %v287_v10  ;;  %v336_v9 = vld [vmem:[%s3789_s20 + $0x470] sm:$0xff] }
  0x57   : > { %3426 = vmatprep.subr.msk.mxu1 %vm704_vm0, %v319_v11  ;;  %v368_v10 = vld [vmem:[%s3789_s20 + $0x570] sm:$0xff]  ;;  %v351_v11 = vld [vmem:[%s3789_s20 + $0x4e8] sm:$0xff] }
  0x59   : > { %3393 = vmatpush3.xpose.msk.msra.mxu0 %vm704_vm0, %v271_v12  ;;  %v383_v12 = vld [vmem:[%s3789_s20 + $0x5e8] sm:$0xff] }
  0x5a   : > { %3427 = vmatpush3.xpose.msk.msra.mxu1 %vm704_vm0, %v303_v13  ;;  %3394 = vmatprep.subr.msk.mxu0 %vm704_vm0, %v286_v14  ;;  %v335_v13 = vld [vmem:[%s3789_s20 + $0x468] sm:$0xff] }
  0x5b   : > { %3428 = vmatprep.subr.msk.mxu1 %vm704_vm0, %v318_v15  ;;  %v367_v14 = vld [vmem:[%s3789_s20 + $0x568] sm:$0xff]  ;;  %v350_v15 = vld [vmem:[%s3789_s20 + $0x4e0] sm:$0xff] }
  0x5d   : > { %3395 = vmatpush3.xpose.msk.msra.mxu0 %vm704_vm0, %v270_v16  ;;  %v382_v16 = vld [vmem:[%s3789_s20 + $0x5e0] sm:$0xff] }
  0x5e   : > { %3429 = vmatpush3.xpose.msk.msra.mxu1 %vm704_vm0, %v302_v17  ;;  %3396 = vmatprep.subr.msk.mxu0 %vm704_vm0, %v285_v18  ;;  %v334_v17 = vld [vmem:[%s3789_s20 + $0x460] sm:$0xff] }
  0x5f   : > { %3430 = vmatprep.subr.msk.mxu1 %vm704_vm0, %v317_v19  ;;  %v366_v18 = vld [vmem:[%s3789_s20 + $0x560] sm:$0xff]  ;;  %v349_v19 = vld [vmem:[%s3789_s20 + $0x4d8] sm:$0xff] }
  0x61   : > { %3397 = vmatpush3.xpose.msk.msra.mxu0 %vm704_vm0, %v269_v20  ;;  %v381_v20 = vld [vmem:[%s3789_s20 + $0x5d8] sm:$0xff] }
  0x62   : > { %3431 = vmatpush3.xpose.msk.msra.mxu1 %vm704_vm0, %v301_v21  ;;  %3398 = vmatprep.subr.msk.mxu0 %vm704_vm0, %v284_v22  ;;  %v333_v21 = vld [vmem:[%s3789_s20 + $0x458] sm:$0xff] }
  0x63   : > { %3432 = vmatprep.subr.msk.mxu1 %vm704_vm0, %v316_v23  ;;  %v365_v22 = vld [vmem:[%s3789_s20 + $0x558] sm:$0xff]  ;;  %v348_v23 = vld [vmem:[%s3789_s20 + $0x4d0] sm:$0xff] }
  0x65   : > { %3399 = vmatpush3.xpose.msk.msra.mxu0 %vm704_vm0, %v268_v24  ;;  %v380_v24 = vld [vmem:[%s3789_s20 + $0x5d0] sm:$0xff] }
  0x66   : > { %3433 = vmatpush3.xpose.msk.msra.mxu1 %vm704_vm0, %v300_v25  ;;  %3400 = vmatprep.subr.msk.mxu0 %vm704_vm0, %v283_v26  ;;  %v332_v25 = vld [vmem:[%s3789_s20 + $0x450] sm:$0xff] }
  0x67   : > { %3434 = vmatprep.subr.msk.mxu1 %vm704_vm0, %v315_v27  ;;  %v364_v26 = vld [vmem:[%s3789_s20 + $0x550] sm:$0xff]  ;;  %v347_v27 = vld [vmem:[%s3789_s20 + $0x4c8] sm:$0xff] }
  0x69   : > { %3401 = vmatpush3.xpose.msk.msra.mxu0 %vm704_vm0, %v267_v28  ;;  %v379_v28 = vld [vmem:[%s3789_s20 + $0x5c8] sm:$0xff] }
  0x6a   : > { %3435 = vmatpush3.xpose.msk.msra.mxu1 %vm704_vm0, %v299_v29  ;;  %3402 = vmatprep.subr.msk.mxu0 %vm704_vm0, %v282_v30  ;;  %v331_v29 = vld [vmem:[%s3789_s20 + $0x448] sm:$0xff] }
  0x6b   : > { %3436 = vmatprep.subr.msk.mxu1 %vm704_vm0, %v314_v31  ;;  %v363_v30 = vld [vmem:[%s3789_s20 + $0x548] sm:$0xff]  ;;  %v346_v31 = vld [vmem:[%s3789_s20 + $0x4c0] sm:$0xff] }
  0x6d   : > { %3403 = vmatpush3.xpose.msk.msra.mxu0 %vm704_vm0, %v266_v32  ;;  %v378_v32 = vld [vmem:[%s3789_s20 + $0x5c0] sm:$0xff] }
  0x6e   : > { %3437 = vmatpush3.xpose.msk.msra.mxu1 %vm704_vm0, %v298_v33  ;;  %3404 = vmatprep.subr.msk.mxu0 %vm704_vm0, %v281_v34  ;;  %v330_v33 = vld [vmem:[%s3789_s20 + $0x440] sm:$0xff] }
  0x6f   : > { %3438 = vmatprep.subr.msk.mxu1 %vm704_vm0, %v313_v35  ;;  %v362_v34 = vld [vmem:[%s3789_s20 + $0x540] sm:$0xff]  ;;  %v345_v35 = vld [vmem:[%s3789_s20 + $0x4b8] sm:$0xff] }
  0x71   : > { %3405 = vmatpush3.xpose.msk.msra.mxu0 %vm704_vm0, %v265_v36  ;;  %v377_v36 = vld [vmem:[%s3789_s20 + $0x5b8] sm:$0xff] }
  0x72   : > { %3439 = vmatpush3.xpose.msk.msra.mxu1 %vm704_vm0, %v297_v37  ;;  %3406 = vmatprep.subr.msk.mxu0 %vm704_vm0, %v280_v38  ;;  %v329_v37 = vld [vmem:[%s3789_s20 + $0x438] sm:$0xff] }
  0x73   : > { %3440 = vmatprep.subr.msk.mxu1 %vm704_vm0, %v312_v39  ;;  %v361_v38 = vld [vmem:[%s3789_s20 + $0x538] sm:$0xff]  ;;  %v344_v39 = vld [vmem:[%s3789_s20 + $0x4b0] sm:$0xff] }
  0x75   : > { %3407 = vmatpush3.xpose.msk.msra.mxu0 %vm704_vm0, %v264_v40  ;;  %v376_v40 = vld [vmem:[%s3789_s20 + $0x5b0] sm:$0xff] }
  0x76   : > { %3441 = vmatpush3.xpose.msk.msra.mxu1 %vm704_vm0, %v296_v41  ;;  %3408 = vmatprep.subr.msk.mxu0 %vm704_vm0, %v279_v42  ;;  %v328_v41 = vld [vmem:[%s3789_s20 + $0x430] sm:$0xff] }
  0x77   : > { %3442 = vmatprep.subr.msk.mxu1 %vm704_vm0, %v311_v43  ;;  %v360_v42 = vld [vmem:[%s3789_s20 + $0x530] sm:$0xff]  ;;  %v343_v43 = vld [vmem:[%s3789_s20 + $0x4a8] sm:$0xff] }
  0x79   : > { %3409 = vmatpush3.xpose.msk.msra.mxu0 %vm704_vm0, %v263_v44  ;;  %v375_v44 = vld [vmem:[%s3789_s20 + $0x5a8] sm:$0xff] }
  0x7a   : > { %3443 = vmatpush3.xpose.msk.msra.mxu1 %vm704_vm0, %v295_v45  ;;  %3410 = vmatprep.subr.msk.mxu0 %vm704_vm0, %v278_v46  ;;  %v327_v45 = vld [vmem:[%s3789_s20 + $0x428] sm:$0xff] }
  0x7b   : > { %3444 = vmatprep.subr.msk.mxu1 %vm704_vm0, %v310_v47  ;;  %v359_v46 = vld [vmem:[%s3789_s20 + $0x528] sm:$0xff]  ;;  %v342_v47 = vld [vmem:[%s3789_s20 + $0x4a0] sm:$0xff] }
  0x7d   : > { %3411 = vmatpush3.xpose.msk.msra.mxu0 %vm704_vm0, %v262_v48  ;;  %v374_v48 = vld [vmem:[%s3789_s20 + $0x5a0] sm:$0xff] }
  0x7e   : > { %3445 = vmatpush3.xpose.msk.msra.mxu1 %vm704_vm0, %v294_v49  ;;  %3412 = vmatprep.subr.msk.mxu0 %vm704_vm0, %v277_v50  ;;  %v326_v49 = vld [vmem:[%s3789_s20 + $0x420] sm:$0xff] }
  0x7f   : > { %3446 = vmatprep.subr.msk.mxu1 %vm704_vm0, %v309_v51  ;;  %v358_v50 = vld [vmem:[%s3789_s20 + $0x520] sm:$0xff]  ;;  %v341_v51 = vld [vmem:[%s3789_s20 + $0x498] sm:$0xff] }
  0x81   : > { %3413 = vmatpush3.xpose.msk.msra.mxu0 %vm704_vm0, %v261_v52  ;;  %v373_v52 = vld [vmem:[%s3789_s20 + $0x598] sm:$0xff] }
  0x82   : > { %3447 = vmatpush3.xpose.msk.msra.mxu1 %vm704_vm0, %v293_v53  ;;  %3414 = vmatprep.subr.msk.mxu0 %vm704_vm0, %v276_v54  ;;  %v325_v53 = vld [vmem:[%s3789_s20 + $0x418] sm:$0xff] }
  0x83   : > { %3448 = vmatprep.subr.msk.mxu1 %vm704_vm0, %v308_v55  ;;  %v357_v54 = vld [vmem:[%s3789_s20 + $0x518] sm:$0xff]  ;;  %v340_v55 = vld [vmem:[%s3789_s20 + $0x490] sm:$0xff] }
  0x85   : > { %3415 = vmatpush3.xpose.msk.msra.mxu0 %vm704_vm0, %v260_v56  ;;  %v372_v56 = vld [vmem:[%s3789_s20 + $0x590] sm:$0xff] }
  0x86   : > { %3449 = vmatpush3.xpose.msk.msra.mxu1 %vm704_vm0, %v292_v57  ;;  %3416 = vmatprep.subr.msk.mxu0 %vm704_vm0, %v275_v58  ;;  %v324_v57 = vld [vmem:[%s3789_s20 + $0x410] sm:$0xff] }
  0x87   : > { %3450 = vmatprep.subr.msk.mxu1 %vm704_vm0, %v307_v59  ;;  %v356_v58 = vld [vmem:[%s3789_s20 + $0x510] sm:$0xff]  ;;  %v339_v59 = vld [vmem:[%s3789_s20 + $0x488] sm:$0xff] }
  0x89   : > { %3417 = vmatpush3.xpose.msk.msra.mxu0 %vm704_vm0, %v259_v60  ;;  %v371_v60 = vld [vmem:[%s3789_s20 + $0x588] sm:$0xff] }
  0x8a   : > { %3451 = vmatpush3.xpose.msk.msra.mxu1 %vm704_vm0, %v291_v61  ;;  %3418 = vmatprep.subr.msk.mxu0 %vm704_vm0, %v274_v62  ;;  %v323_v61 = vld [vmem:[%s3789_s20 + $0x408] sm:$0xff] }
  0x8b   : > { %3452 = vmatprep.subr.msk.mxu1 %vm704_vm0, %v306_v63  ;;  %v355_v62 = vld [vmem:[%s3789_s20 + $0x508] sm:$0xff]  ;;  %v338_v63 = vld [vmem:[%s3789_s20 + $0x480] sm:$0xff] }
  0x8d   : > { %3419 = vmatpush3.xpose.msk.msra.mxu0 %vm704_vm0, %v258_v1  ;;  %v370_v1 = vld [vmem:[%s3789_s20 + $0x580] sm:$0xff] }
  0x8e   : > { %3453 = vmatpush3.xpose.msk.msra.mxu1 %vm704_vm0, %v290_v2  ;;  %3456 = vmatprep.subr.msk.mxu0 %vm704_vm0, %v353_v3  ;;  %v322_v2 = vld [vmem:[%s3789_s20 + $0x400] sm:$0xff] }
  0x8f   : > { %3490 = vmatprep.subr.msk.mxu1 %vm704_vm0, %v385_v4  ;;  %v354_v3 = vld [vmem:[%s3789_s20 + $0x500] sm:$0xff]  ;;  %v417_v4 = vld [vmem:[%s3789_s20 + $0x6f8] sm:$0xff] }
  0x90   : > { %3421 = vmatmul.mubr.msk.f32.vlgmr.msra.gmra.mxu0 %vm704_vm0, %v3780_v0 }
  0x91   : > { %3455 = vmatmul.mubr.msk.f32.vlgmr.msra.gmra.mxu1 %vm704_vm0, %v3780_v0  ;;  %3457 = vmatpush3.xpose.msk.msra.mxu0 %vm704_vm0, %v337_v5  ;;  %v449_v5 = vld [vmem:[%s3789_s20 + $0x7f8] sm:$0xff] }
  0x92   : > { %3491 = vmatpush3.xpose.msk.msra.mxu1 %vm704_vm0, %v369_v6  ;;  %3458 = vmatprep.subr.msk.mxu0 %vm704_vm0, %v352_v7  ;;  %v401_v6 = vld [vmem:[%s3789_s20 + $0x678] sm:$0xff] }
  0x93   : > { %3492 = vmatprep.subr.msk.mxu1 %vm704_vm0, %v384_v8  ;;  %3488 = vmatprep.mubr.msk.f32.mxu0 %vm704_vm0, %v3780_v0  ;;  %v433_v7 = vld [vmem:[%s3789_s20 + $0x778] sm:$0xff]  ;;  %v416_v8 = vld [vmem:[%s3789_s20 + $0x6f0] sm:$0xff] }
  0x94   : > { %3522 = vmatprep.mubr.msk.f32.mxu1 %vm704_vm0, %v3780_v0 }
  0x95   : > { %3459 = vmatpush3.xpose.msk.msra.mxu0 %vm704_vm0, %v336_v9  ;;  %v448_v9 = vld [vmem:[%s3789_s20 + $0x7f0] sm:$0xff] }
  0x96   : > { %3493 = vmatpush3.xpose.msk.msra.mxu1 %vm704_vm0, %v368_v10  ;;  %3460 = vmatprep.subr.msk.mxu0 %vm704_vm0, %v351_v11  ;;  %v400_v10 = vld [vmem:[%s3789_s20 + $0x670] sm:$0xff] }
  0x97   : > { %3494 = vmatprep.subr.msk.mxu1 %vm704_vm0, %v383_v12  ;;  %v432_v11 = vld [vmem:[%s3789_s20 + $0x770] sm:$0xff]  ;;  %v415_v12 = vld [vmem:[%s3789_s20 + $0x6e8] sm:$0xff] }
  0x99   : > { %3461 = vmatpush3.xpose.msk.msra.mxu0 %vm704_vm0, %v335_v13  ;;  %v447_v13 = vld [vmem:[%s3789_s20 + $0x7e8] sm:$0xff] }
  0x9a   : > { %3495 = vmatpush3.xpose.msk.msra.mxu1 %vm704_vm0, %v367_v14  ;;  %3462 = vmatprep.subr.msk.mxu0 %vm704_vm0, %v350_v15  ;;  %v399_v14 = vld [vmem:[%s3789_s20 + $0x668] sm:$0xff] }
  0x9b   : > { %3496 = vmatprep.subr.msk.mxu1 %vm704_vm0, %v382_v16  ;;  %v431_v15 = vld [vmem:[%s3789_s20 + $0x768] sm:$0xff]  ;;  %v414_v16 = vld [vmem:[%s3789_s20 + $0x6e0] sm:$0xff] }
  0x9d   : > { %3463 = vmatpush3.xpose.msk.msra.mxu0 %vm704_vm0, %v334_v17  ;;  %v446_v17 = vld [vmem:[%s3789_s20 + $0x7e0] sm:$0xff] }
  0x9e   : > { %3497 = vmatpush3.xpose.msk.msra.mxu1 %vm704_vm0, %v366_v18  ;;  %3464 = vmatprep.subr.msk.mxu0 %vm704_vm0, %v349_v19  ;;  %v430_v18 = vld [vmem:[%s3789_s20 + $0x760] sm:$0xff]  ;;  %v413_v19 = vld [vmem:[%s3789_s20 + $0x6d8] sm:$0xff] }
  0x9f   : > { %3498 = vmatprep.subr.msk.mxu1 %vm704_vm0, %v381_v20  ;;  %v445_v20 = vld [vmem:[%s3789_s20 + $0x7d8] sm:$0xff] }
  0xa1   : > { %3465 = vmatpush3.xpose.msk.msra.mxu0 %vm704_vm0, %v333_v21  ;;  %v397_v21 = vld [vmem:[%s3789_s20 + $0x658] sm:$0xff] }
  0xa2   : > { %3499 = vmatpush3.xpose.msk.msra.mxu1 %vm704_vm0, %v365_v22  ;;  %3466 = vmatprep.subr.msk.mxu0 %vm704_vm0, %v348_v23  ;;  %v429_v22 = vld [vmem:[%s3789_s20 + $0x758] sm:$0xff]  ;;  %v412_v23 = vld [vmem:[%s3789_s20 + $0x6d0] sm:$0xff] }
  0xa3   : > { %3500 = vmatprep.subr.msk.mxu1 %vm704_vm0, %v380_v24  ;;  %v444_v24 = vld [vmem:[%s3789_s20 + $0x7d0] sm:$0xff] }
  0xa5   : > { %3467 = vmatpush3.xpose.msk.msra.mxu0 %vm704_vm0, %v332_v25  ;;  %v396_v25 = vld [vmem:[%s3789_s20 + $0x650] sm:$0xff] }
  0xa6   : > { %3501 = vmatpush3.xpose.msk.msra.mxu1 %vm704_vm0, %v364_v26  ;;  %3468 = vmatprep.subr.msk.mxu0 %vm704_vm0, %v347_v27  ;;  %v428_v26 = vld [vmem:[%s3789_s20 + $0x750] sm:$0xff]  ;;  %v411_v27 = vld [vmem:[%s3789_s20 + $0x6c8] sm:$0xff] }
  0xa7   : > { %3502 = vmatprep.subr.msk.mxu1 %vm704_vm0, %v379_v28  ;;  %v443_v28 = vld [vmem:[%s3789_s20 + $0x7c8] sm:$0xff] }
  0xa9   : > { %3469 = vmatpush3.xpose.msk.msra.mxu0 %vm704_vm0, %v331_v29  ;;  %v395_v29 = vld [vmem:[%s3789_s20 + $0x648] sm:$0xff] }
  0xaa   : > { %3503 = vmatpush3.xpose.msk.msra.mxu1 %vm704_vm0, %v363_v30  ;;  %3470 = vmatprep.subr.msk.mxu0 %vm704_vm0, %v346_v31  ;;  %v427_v30 = vld [vmem:[%s3789_s20 + $0x748] sm:$0xff]  ;;  %v410_v31 = vld [vmem:[%s3789_s20 + $0x6c0] sm:$0xff] }
  0xab   : > { %3504 = vmatprep.subr.msk.mxu1 %vm704_vm0, %v378_v32  ;;  %v442_v32 = vld [vmem:[%s3789_s20 + $0x7c0] sm:$0xff] }
  0xad   : > { %3471 = vmatpush3.xpose.msk.msra.mxu0 %vm704_vm0, %v330_v33  ;;  %v394_v33 = vld [vmem:[%s3789_s20 + $0x640] sm:$0xff] }
  0xae   : > { %3505 = vmatpush3.xpose.msk.msra.mxu1 %vm704_vm0, %v362_v34  ;;  %3472 = vmatprep.subr.msk.mxu0 %vm704_vm0, %v345_v35  ;;  %v426_v34 = vld [vmem:[%s3789_s20 + $0x740] sm:$0xff]  ;;  %v409_v35 = vld [vmem:[%s3789_s20 + $0x6b8] sm:$0xff] }
  0xaf   : > { %3506 = vmatprep.subr.msk.mxu1 %vm704_vm0, %v377_v36  ;;  %v441_v36 = vld [vmem:[%s3789_s20 + $0x7b8] sm:$0xff] }
  0xb1   : > { %3473 = vmatpush3.xpose.msk.msra.mxu0 %vm704_vm0, %v329_v37  ;;  %v393_v37 = vld [vmem:[%s3789_s20 + $0x638] sm:$0xff] }
  0xb2   : > { %3507 = vmatpush3.xpose.msk.msra.mxu1 %vm704_vm0, %v361_v38  ;;  %3474 = vmatprep.subr.msk.mxu0 %vm704_vm0, %v344_v39  ;;  %v425_v38 = vld [vmem:[%s3789_s20 + $0x738] sm:$0xff]  ;;  %v408_v39 = vld [vmem:[%s3789_s20 + $0x6b0] sm:$0xff] }
  0xb3   : > { %3508 = vmatprep.subr.msk.mxu1 %vm704_vm0, %v376_v40  ;;  %v440_v40 = vld [vmem:[%s3789_s20 + $0x7b0] sm:$0xff] }
  0xb5   : > { %3475 = vmatpush3.xpose.msk.msra.mxu0 %vm704_vm0, %v328_v41  ;;  %v392_v41 = vld [vmem:[%s3789_s20 + $0x630] sm:$0xff] }
  0xb6   : > { %3509 = vmatpush3.xpose.msk.msra.mxu1 %vm704_vm0, %v360_v42  ;;  %3476 = vmatprep.subr.msk.mxu0 %vm704_vm0, %v343_v43  ;;  %v424_v42 = vld [vmem:[%s3789_s20 + $0x730] sm:$0xff]  ;;  %v407_v43 = vld [vmem:[%s3789_s20 + $0x6a8] sm:$0xff] }
  0xb7   : > { %3510 = vmatprep.subr.msk.mxu1 %vm704_vm0, %v375_v44  ;;  %v439_v44 = vld [vmem:[%s3789_s20 + $0x7a8] sm:$0xff] }
  0xb9   : > { %3477 = vmatpush3.xpose.msk.msra.mxu0 %vm704_vm0, %v327_v45  ;;  %v391_v45 = vld [vmem:[%s3789_s20 + $0x628] sm:$0xff] }
  0xba   : > { %3511 = vmatpush3.xpose.msk.msra.mxu1 %vm704_vm0, %v359_v46  ;;  %3478 = vmatprep.subr.msk.mxu0 %vm704_vm0, %v342_v47  ;;  %v423_v46 = vld [vmem:[%s3789_s20 + $0x728] sm:$0xff]  ;;  %v406_v47 = vld [vmem:[%s3789_s20 + $0x6a0] sm:$0xff] }
  0xbb   : > { %3512 = vmatprep.subr.msk.mxu1 %vm704_vm0, %v374_v48  ;;  %v438_v48 = vld [vmem:[%s3789_s20 + $0x7a0] sm:$0xff] }
  0xbd   : > { %3479 = vmatpush3.xpose.msk.msra.mxu0 %vm704_vm0, %v326_v49  ;;  %v390_v49 = vld [vmem:[%s3789_s20 + $0x620] sm:$0xff] }
  0xbe   : > { %3513 = vmatpush3.xpose.msk.msra.mxu1 %vm704_vm0, %v358_v50  ;;  %3480 = vmatprep.subr.msk.mxu0 %vm704_vm0, %v341_v51  ;;  %v422_v50 = vld [vmem:[%s3789_s20 + $0x720] sm:$0xff]  ;;  %v405_v51 = vld [vmem:[%s3789_s20 + $0x698] sm:$0xff] }
  0xbf   : > { %3514 = vmatprep.subr.msk.mxu1 %vm704_vm0, %v373_v52  ;;  %v437_v52 = vld [vmem:[%s3789_s20 + $0x798] sm:$0xff] }
  0xc1   : > { %3481 = vmatpush3.xpose.msk.msra.mxu0 %vm704_vm0, %v325_v53  ;;  %v389_v53 = vld [vmem:[%s3789_s20 + $0x618] sm:$0xff] }
  0xc2   : > { %3515 = vmatpush3.xpose.msk.msra.mxu1 %vm704_vm0, %v357_v54  ;;  %3482 = vmatprep.subr.msk.mxu0 %vm704_vm0, %v340_v55  ;;  %v421_v54 = vld [vmem:[%s3789_s20 + $0x718] sm:$0xff]  ;;  %v404_v55 = vld [vmem:[%s3789_s20 + $0x690] sm:$0xff] }
  0xc3   : > { %3516 = vmatprep.subr.msk.mxu1 %vm704_vm0, %v372_v56  ;;  %v436_v56 = vld [vmem:[%s3789_s20 + $0x790] sm:$0xff] }
  0xc5   : > { %3483 = vmatpush3.xpose.msk.msra.mxu0 %vm704_vm0, %v324_v57  ;;  %v584_v57 = vlaneseq }
  0xc6   : > { %3517 = vmatpush3.xpose.msk.msra.mxu1 %vm704_vm0, %v356_v58  ;;  %3484 = vmatprep.subr.msk.mxu0 %vm704_vm0, %v339_v59  ;;  %v388_v58 = vld [vmem:[%s3789_s20 + $0x610] sm:$0xff] }
  0xc7   : > { %3518 = vmatprep.subr.msk.mxu1 %vm704_vm0, %v371_v60  ;;  %v420_v59 = vld [vmem:[%s3789_s20 + $0x710] sm:$0xff]  ;;  %v403_v60 = vld [vmem:[%s3789_s20 + $0x688] sm:$0xff] }
  0xc9   : > { %3485 = vmatpush3.xpose.msk.msra.mxu0 %vm704_vm0, %v323_v61  ;;  %v435_v61 = vld [vmem:[%s3789_s20 + $0x788] sm:$0xff] }
  0xca   : > { %3519 = vmatpush3.xpose.msk.msra.mxu1 %vm704_vm0, %v355_v62  ;;  %3486 = vmatprep.subr.msk.mxu0 %vm704_vm0, %v338_v63  ;;  %v4317_v62 = vshrl.u32 %v584_v57, 7  ;;  %v387_v63 = vld [vmem:[%s3789_s20 + $0x608] sm:$0xff] }
  0xcb   : > { %3520 = vmatprep.subr.msk.mxu1 %vm704_vm0, %v370_v1  ;;  %v419_v1 = vld [vmem:[%s3789_s20 + $0x708] sm:$0xff] }
  0xcc   : > { %v507_v57 = vld [vmem:[%s3789_s20 + $0x9c8] sm:$0xff] }
  0xcd   : > { %3487 = vmatpush3.xpose.msk.msra.mxu0 %vm704_vm0, %v322_v2  ;;  %v402_v2 = vld [vmem:[%s3789_s20 + $0x680] sm:$0xff] }
  0xce   : > { %3521 = vmatpush3.xpose.msk.msra.mxu1 %vm704_vm0, %v354_v3  ;;  %3524 = vmatprep.subr.msk.mxu0 %vm704_vm0, %v417_v4  ;;  %v434_v3 = vld [vmem:[%s3789_s20 + $0x780] sm:$0xff]  ;;  %v4334_v4 = vsub.s32 0, %v4317_v62 }
  0xcf   : > { %3558 = vmatprep.subr.msk.mxu1 %vm704_vm0, %v449_v5  ;;  %v4337_v5 = vsub.s32 2, %v4317_v62 }
  0xd0   : > { %3489 = vmatmul.mubr.msk.f32.vlgmr.msra.gmra.mxu0 %vm704_vm0, %v3780_v0 }
  0xd1   : > { %3523 = vmatmul.mubr.msk.f32.vlgmr.msra.gmra.mxu1 %vm704_vm0, %v3780_v0  ;;  %3525 = vmatpush3.xpose.msk.msra.mxu0 %vm704_vm0, %v401_v6  ;;  %v386_v6 = vld [vmem:[%s3789_s20 + $0x600] sm:$0xff] }
  0xd2   : > { %3559 = vmatpush3.xpose.msk.msra.mxu1 %vm704_vm0, %v433_v7  ;;  %3526 = vmatprep.subr.msk.mxu0 %vm704_vm0, %v416_v8  ;;  %v418_v7 = vld [vmem:[%s3789_s20 + $0x700] sm:$0xff] }
  0xd3   : > { %3560 = vmatprep.subr.msk.mxu1 %vm704_vm0, %v448_v9  ;;  %3556 = vmatprep.mubr.msk.f32.mxu0 %vm704_vm0, %v3780_v0  ;;  %v4344_v8 = vld [vmem:[%s4329_s24] sm:$0xff]  ;;  %v481_v9 = vld [vmem:[%s3789_s20 + $0x8f8] sm:$0xff] }
  0xd4   : > { %3590 = vmatprep.mubr.msk.f32.mxu1 %vm704_vm0, %v3780_v0  ;;  %v398_v0 = vld [vmem:[%s3789_s20 + $0x660] sm:$0xff] }
  0xd5   : > { %3527 = vmatpush3.xpose.msk.msra.mxu0 %vm704_vm0, %v400_v10  ;;  %v513_v10 = vld [vmem:[%s3789_s20 + $0x9f8] sm:$0xff] }
  0xd6   : > { %3561 = vmatpush3.xpose.msk.msra.mxu1 %vm704_vm0, %v432_v11  ;;  %3528 = vmatprep.subr.msk.mxu0 %vm704_vm0, %v415_v12  ;;  %v4349_v11 = vsub.s32 1, %v4317_v62  ;;  %v3746_v12 = vmov 1983009808  }
  0xd7   : > { %3562 = vmatprep.subr.msk.mxu1 %vm704_vm0, %v447_v13  ;;  %v2739_v13 = vunpack.c.l.s4 %v3746_v12  ;;  %v456_v12 = vld [vmem:[%s3789_s20 + $0x830] sm:$0xff] }
  0xd9   : > { %3529 = vmatpush3.xpose.msk.msra.mxu0 %vm704_vm0, %v399_v14  ;;  %v4352_v14 = vsub.s32 3, %v4317_v62 }
  0xda   : > { %3563 = vmatpush3.xpose.msk.msra.mxu1 %vm704_vm0, %v431_v15  ;;  %3530 = vmatprep.subr.msk.mxu0 %vm704_vm0, %v414_v16  ;;  %v587_v15 = vrot.slane %v4344_v8, %v4334_v4  ;;  %v595_v16 = vrot.slane %v4344_v8, %v4337_v5 }
  0xdb   : > { %3564 = vmatprep.subr.msk.mxu1 %vm704_vm0, %v446_v17  ;;  %v465_v17 = vld [vmem:[%s3789_s20 + $0x878] sm:$0xff] }
  0xdd   : > { %3531 = vmatpush3.xpose.msk.msra.mxu0 %vm704_vm0, %v398_v0  ;;  %v497_v0 = vld [vmem:[%s3789_s20 + $0x978] sm:$0xff] }
  0xde   : > { %3565 = vmatpush3.xpose.msk.msra.mxu1 %vm704_vm0, %v430_v18  ;;  %3532 = vmatprep.subr.msk.mxu0 %vm704_vm0, %v413_v19  ;;  %v591_v18 = vrot.slane %v4344_v8, %v4349_v11  ;;  %v2740_v19 = vunpack.c.0.s8 %v2739_v13  ;;  %v488_v13 = vld [vmem:[%s3789_s20 + $0x930] sm:$0xff] }
  0xdf   : > { %3566 = vmatprep.subr.msk.mxu1 %vm704_vm0, %v445_v20  ;;  %v599_v20 = vrot.slane %v4344_v8, %v4352_v14 }
  0xe1   : > { %3533 = vmatpush3.xpose.msk.msra.mxu0 %vm704_vm0, %v397_v21  ;;  %v480_v21 = vld [vmem:[%s3789_s20 + $0x8f0] sm:$0xff] }
  0xe2   : > { %3567 = vmatpush3.xpose.msk.msra.mxu1 %vm704_vm0, %v429_v22  ;;  %3534 = vmatprep.subr.msk.mxu0 %vm704_vm0, %v412_v23  ;;  %v512_v22 = vld [vmem:[%s3789_s20 + $0x9f0] sm:$0xff] }
  0xe3   : > { %3568 = vmatprep.subr.msk.mxu1 %vm704_vm0, %v444_v24 }
  0xe5   : > { %3535 = vmatpush3.xpose.msk.msra.mxu0 %vm704_vm0, %v396_v25  ;;  %v4373_v25 = vld [vmem:[%s4711_s0] sm:$0x3] }
  0xe6   : > { %3569 = vmatpush3.xpose.msk.msra.mxu1 %vm704_vm0, %v428_v26  ;;  %3536 = vmatprep.subr.msk.mxu0 %vm704_vm0, %v411_v27 }
  0xe7   : > { %3570 = vmatprep.subr.msk.mxu1 %vm704_vm0, %v443_v28 }
  0xe9   : > { %3537 = vmatpush3.xpose.msk.msra.mxu0 %vm704_vm0, %v395_v29 }
  0xea   : > { %3571 = vmatpush3.xpose.msk.msra.mxu1 %vm704_vm0, %v427_v30  ;;  %3538 = vmatprep.subr.msk.mxu0 %vm704_vm0, %v410_v31  ;;  %v464_v30 = vld [vmem:[%s3789_s20 + $0x870] sm:$0xff] }
  0xeb   : > { %3572 = vmatprep.subr.msk.mxu1 %vm704_vm0, %v442_v32  ;;  %v496_v31 = vld [vmem:[%s3789_s20 + $0x970] sm:$0xff] }
  0xed   : > { %3539 = vmatpush3.xpose.msk.msra.mxu0 %vm704_vm0, %v394_v33  ;;  %v4386_v33 = vsub.s32 %v2740_v19, %v4317_v62  ;;  %v502_v19 = vld [vmem:[%s3789_s20 + $0x9a0] sm:$0xff] }
  0xee   : > { %3573 = vmatpush3.xpose.msk.msra.mxu1 %vm704_vm0, %v426_v34  ;;  %3540 = vmatprep.subr.msk.mxu0 %vm704_vm0, %v409_v35  ;;  %v479_v35 = vld [vmem:[%s3789_s20 + $0x8e8] sm:$0xff] }
  0xef   : > { %3574 = vmatprep.subr.msk.mxu1 %vm704_vm0, %v441_v36  ;;  %v511_v36 = vld [vmem:[%s3789_s20 + $0x9e8] sm:$0xff] }
  0xf1   : > { %3541 = vmatpush3.xpose.msk.msra.mxu0 %vm704_vm0, %v393_v37 }
  0xf2   : > { %3575 = vmatpush3.xpose.msk.msra.mxu1 %vm704_vm0, %v425_v38  ;;  %3542 = vmatprep.subr.msk.mxu0 %vm704_vm0, %v408_v39  ;;  %v463_v39 = vld [vmem:[%s3789_s20 + $0x868] sm:$0xff] }
  0xf3   : > { %3576 = vmatprep.subr.msk.mxu1 %vm704_vm0, %v440_v40  ;;  %v495_v40 = vld [vmem:[%s3789_s20 + $0x968] sm:$0xff] }
  0xf5   : > { %3543 = vmatpush3.xpose.msk.msra.mxu0 %vm704_vm0, %v392_v41 }
  0xf6   : > { %3577 = vmatpush3.xpose.msk.msra.mxu1 %vm704_vm0, %v424_v42  ;;  %3544 = vmatprep.subr.msk.mxu0 %vm704_vm0, %v407_v43  ;;  %v478_v43 = vld [vmem:[%s3789_s20 + $0x8e0] sm:$0xff] }
  0xf7   : > { %3578 = vmatprep.subr.msk.mxu1 %vm704_vm0, %v439_v44  ;;  %v510_v44 = vld [vmem:[%s3789_s20 + $0x9e0] sm:$0xff] }
  0xf9   : > { %3545 = vmatpush3.xpose.msk.msra.mxu0 %vm704_vm0, %v391_v45 }
  0xfa   : > { %3579 = vmatpush3.xpose.msk.msra.mxu1 %vm704_vm0, %v423_v46  ;;  %3546 = vmatprep.subr.msk.mxu0 %vm704_vm0, %v406_v47  ;;  %v462_v46 = vld [vmem:[%s3789_s20 + $0x860] sm:$0xff] }
  0xfb   : > { %3580 = vmatprep.subr.msk.mxu1 %vm704_vm0, %v438_v48  ;;  %v494_v47 = vld [vmem:[%s3789_s20 + $0x960] sm:$0xff]  ;;  %v477_v48 = vld [vmem:[%s3789_s20 + $0x8d8] sm:$0xff] }
  0xfd   : > { %3547 = vmatpush3.xpose.msk.msra.mxu0 %vm704_vm0, %v390_v49  ;;  %v509_v49 = vld [vmem:[%s3789_s20 + $0x9d8] sm:$0xff] }
  0xfe   : > { %3581 = vmatpush3.xpose.msk.msra.mxu1 %vm704_vm0, %v422_v50  ;;  %3548 = vmatprep.subr.msk.mxu0 %vm704_vm0, %v405_v51  ;;  %v461_v50 = vld [vmem:[%s3789_s20 + $0x858] sm:$0xff] }
  0xff   : > { %3582 = vmatprep.subr.msk.mxu1 %vm704_vm0, %v437_v52  ;;  %v493_v51 = vld [vmem:[%s3789_s20 + $0x958] sm:$0xff]  ;;  %v476_v52 = vld [vmem:[%s3789_s20 + $0x8d0] sm:$0xff] }
 0x101   : > { %3549 = vmatpush3.xpose.msk.msra.mxu0 %vm704_vm0, %v389_v53  ;;  %v508_v53 = vld [vmem:[%s3789_s20 + $0x9d0] sm:$0xff] }
 0x102   : > { %3583 = vmatpush3.xpose.msk.msra.mxu1 %vm704_vm0, %v421_v54  ;;  %3550 = vmatprep.subr.msk.mxu0 %vm704_vm0, %v404_v55  ;;  %v460_v54 = vld [vmem:[%s3789_s20 + $0x850] sm:$0xff] }
 0x103   : > { %3584 = vmatprep.subr.msk.mxu1 %vm704_vm0, %v436_v56  ;;  %v492_v55 = vld [vmem:[%s3789_s20 + $0x950] sm:$0xff]  ;;  %v475_v56 = vld [vmem:[%s3789_s20 + $0x8c8] sm:$0xff] }
 0x105   : > { %3551 = vmatpush3.xpose.msk.msra.mxu0 %vm704_vm0, %v388_v58  ;;  %v459_v58 = vld [vmem:[%s3789_s20 + $0x848] sm:$0xff] }
 0x106   : > { %3585 = vmatpush3.xpose.msk.msra.mxu1 %vm704_vm0, %v420_v59  ;;  %3552 = vmatprep.subr.msk.mxu0 %vm704_vm0, %v403_v60  ;;  %v491_v59 = vld [vmem:[%s3789_s20 + $0x948] sm:$0xff]  ;;  %v474_v60 = vld [vmem:[%s3789_s20 + $0x8c0] sm:$0xff] }
 0x107   : > { %3586 = vmatprep.subr.msk.mxu1 %vm704_vm0, %v435_v61  ;;  %v506_v61 = vld [vmem:[%s3789_s20 + $0x9c0] sm:$0xff] }
 0x109   : > { %3553 = vmatpush3.xpose.msk.msra.mxu0 %vm704_vm0, %v387_v63  ;;  %v458_v63 = vld [vmem:[%s3789_s20 + $0x840] sm:$0xff] }
 0x10a   : > { %3587 = vmatpush3.xpose.msk.msra.mxu1 %vm704_vm0, %v419_v1  ;;  %3554 = vmatprep.subr.msk.mxu0 %vm704_vm0, %v402_v2  ;;  %v490_v1 = vld [vmem:[%s3789_s20 + $0x940] sm:$0xff]  ;;  %v473_v2 = vld [vmem:[%s3789_s20 + $0x8b8] sm:$0xff] }
 0x10b   : > { %3588 = vmatprep.subr.msk.mxu1 %vm704_vm0, %v434_v3  ;;  %v505_v3 = vld [vmem:[%s3789_s20 + $0x9b8] sm:$0xff] }
 0x10d   : > { %3555 = vmatpush3.xpose.msk.msra.mxu0 %vm704_vm0, %v386_v6  ;;  %v457_v6 = vld [vmem:[%s3789_s20 + $0x838] sm:$0xff] }
 0x10e   : > { %3589 = vmatpush3.xpose.msk.msra.mxu1 %vm704_vm0, %v418_v7  ;;  %3592 = vmatprep.subr.msk.mxu0 %vm704_vm0, %v481_v9  ;;  %v489_v7 = vld [vmem:[%s3789_s20 + $0x938] sm:$0xff]  ;;  %v472_v9 = vld [vmem:[%s3789_s20 + $0x8b0] sm:$0xff] }
 0x10f   : > { %3626 = vmatprep.subr.msk.mxu1 %vm704_vm0, %v513_v10  ;;  %v504_v10 = vld [vmem:[%s3789_s20 + $0x9b0] sm:$0xff] }
 0x110   : > { %v1926_v23 = vpop.f32.mrf.mxu0  ;;  %3557 = vmatmul.mubr.msk.f32.vlgmr.msra.gmra.mxu0 %vm704_vm0, %v4373_v25 }
 0x111   : > { %v1997_v24 = vpop.f32.mrf.mxu1  ;;  %3591 = vmatmul.mubr.msk.f32.vlgmr.msra.gmra.mxu1 %vm704_vm0, %v4373_v25  ;;  %v1927_v26 = vadd.f32 %v1926_v23, %v587_v15  ;;  %3593 = vmatpush3.xpose.msk.msra.mxu0 %vm704_vm0, %v465_v17  ;;  %v471_v15 = vld [vmem:[%s3789_s20 + $0x8a8] sm:$0xff]  ;;  %v501_v23 = vld [vmem:[%s3789_s20 + $0x998] sm:$0xff] }
 0x112   : > { %v1998_v27 = vadd.f32 %v1997_v24, %v595_v16  ;;  %3627 = vmatpush3.xpose.msk.msra.mxu1 %vm704_vm0, %v497_v0  ;;  %v1928_v28 = vpop.f32.mrf.mxu0  ;;  %3594 = vmatprep.subr.msk.mxu0 %vm704_vm0, %v480_v21  ;;  %v503_v16 = vld [vmem:[%s3789_s20 + $0x9a8] sm:$0xff]  ;;  %v486_v21 = vld [vmem:[%s3789_s20 + $0x920] sm:$0xff]  ;;  %v453_v24 = vld [vmem:[%s3789_s20 + $0x818] sm:$0xff] }
 0x113   : > { %v1999_v29 = vpop.f32.mrf.mxu1  ;;  %3628 = vmatprep.subr.msk.mxu1 %vm704_vm0, %v512_v22  ;;  %v1929_v32 = vadd.f32 %v1928_v28, %v591_v18  ;;  %3624 = vmatprep.mubr.msk.f32.mxu0 %vm704_vm0, %v4373_v25  ;;  %v455_v17 = vld [vmem:[%s3789_s20 + $0x828] sm:$0xff]  ;;  %v470_v18 = vld [vmem:[%s3789_s20 + $0x8a0] sm:$0xff]  ;;  %v469_v22 = vld [vmem:[%s3789_s20 + $0x898] sm:$0xff] }
 0x114   : > { %v2000_v34 = vadd.f32 %v1999_v29, %v599_v20  ;;  %3658 = vmatprep.mubr.msk.f32.mxu1 %vm704_vm0, %v4373_v25  ;;  %v487_v0 = vld [vmem:[%s3789_s20 + $0x928] sm:$0xff]  ;;  %v454_v20 = vld [vmem:[%s3789_s20 + $0x820] sm:$0xff]  ;;  %v500_v28 = vld [vmem:[%s3789_s20 + $0x990] sm:$0xff] }
 0x115   : > { %v2736_v37 = vcombine.low %v1927_v26, %v1929_v32  ;;  %3595 = vmatpush3.xpose.msk.msra.mxu0 %vm704_vm0, %v464_v30  ;;  %v485_v26 = vld [vmem:[%s3789_s20 + $0x918] sm:$0xff]  ;;  %v452_v29 = vld [vmem:[%s3789_s20 + $0x810] sm:$0xff]  ;;  %v499_v32 = vld [vmem:[%s3789_s20 + $0x988] sm:$0xff] }
 0x116   : > { %v2737_v38 = vcombine.low %v1998_v27, %v2000_v34  ;;  %3629 = vmatpush3.xpose.msk.msra.mxu1 %vm704_vm0, %v496_v31  ;;  %3596 = vmatprep.subr.msk.mxu0 %vm704_vm0, %v479_v35  ;;  %v468_v27 = vld [vmem:[%s3789_s20 + $0x890] sm:$0xff]  ;;  %v467_v31 = vld [vmem:[%s3789_s20 + $0x888] sm:$0xff] }
 0x117   : > { %3630 = vmatprep.subr.msk.mxu1 %vm704_vm0, %v511_v36  ;;  %v2744_v41 = vrot.slane %v2736_v37, %v4386_v33  ;;  %v484_v30 = vld [vmem:[%s3789_s20 + $0x910] sm:$0xff]  ;;  %v451_v34 = vld [vmem:[%s3789_s20 + $0x808] sm:$0xff]  ;;  %v466_v36 = vld [vmem:[%s3789_s20 + $0x880] sm:$0xff] }
 0x118   : > { %v2751_v42 = vrot.slane %v2737_v38, %v4386_v33  ;;  %v483_v35 = vld [vmem:[%s3789_s20 + $0x908] sm:$0xff]  ;;  %v498_v37 = vld [vmem:[%s3789_s20 + $0x980] sm:$0xff]  ;;  %v4510_v38 = vsub.s32 4, %v4317_v62 }
 0x119   : > { %3597 = vmatpush3.xpose.msk.msra.mxu0 %vm704_vm0, %v463_v39  ;;  %v4513_v39 = vsub.s32 6, %v4317_v62 }
 0x11a   : > { %v2752_v45 = vcombine.low %v2744_v41, %v2751_v42  ;;  %3631 = vmatpush3.xpose.msk.msra.mxu1 %vm704_vm0, %v495_v40  ;;  %3598 = vmatprep.subr.msk.mxu0 %vm704_vm0, %v478_v43  ;;  %v450_v40 = vld [vmem:[%s3789_s20 + $0x800] sm:$0xff]  ;;  %v545_v42 = vld [vmem:[%s3789_s20 + $0xaf8] sm:$0xff] }
 0x11b   : > { %3632 = vmatprep.subr.msk.mxu1 %vm704_vm0, %v510_v44  ;;  %v482_v41 = vld [vmem:[%s3789_s20 + $0x900] sm:$0xff]  ;;  %v577_v43 = vld [vmem:[%s3789_s20 + $0xbf8] sm:$0xff]  ;;  %v4522_v44 = vsub.s32 5, %v4317_v62 }
 0x11c   : > { %2844 = vst [vmem:[%s4408_s30] sm:$0xff] %v2752_v45  ;;  %v4525_v45 = vsub.s32 7, %v4317_v62 }
 0x11d   : > { %3599 = vmatpush3.xpose.msk.msra.mxu0 %vm704_vm0, %v462_v46  ;;  %v603_v46 = vrot.slane %v4344_v8, %v4510_v38  ;;  %v607_v62 = vrot.slane %v4344_v8, %v4522_v44 }
 0x11e   : > { %3633 = vmatpush3.xpose.msk.msra.mxu1 %vm704_vm0, %v494_v47  ;;  %3600 = vmatprep.subr.msk.mxu0 %vm704_vm0, %v477_v48  ;;  %v611_v47 = vrot.slane %v4344_v8, %v4513_v39  ;;  %v529_v48 = vld [vmem:[%s3789_s20 + $0xa78] sm:$0xff] }
 0x11f   : > { %3634 = vmatprep.subr.msk.mxu1 %vm704_vm0, %v509_v49  ;;  %v561_v49 = vld [vmem:[%s3789_s20 + $0xb78] sm:$0xff] }
 0x121   : > { %3601 = vmatpush3.xpose.msk.msra.mxu0 %vm704_vm0, %v461_v50  ;;  %v615_v50 = vrot.slane %v4344_v8, %v4525_v45 }
 0x122   : > { %3635 = vmatpush3.xpose.msk.msra.mxu1 %vm704_vm0, %v493_v51  ;;  %3602 = vmatprep.subr.msk.mxu0 %vm704_vm0, %v476_v52  ;;  %v544_v51 = vld [vmem:[%s3789_s20 + $0xaf0] sm:$0xff] }
 0x123   : > { %3636 = vmatprep.subr.msk.mxu1 %vm704_vm0, %v508_v53  ;;  %v576_v52 = vld [vmem:[%s3789_s20 + $0xbf0] sm:$0xff] }
 0x125   : > { %3603 = vmatpush3.xpose.msk.msra.mxu0 %vm704_vm0, %v460_v54 }
 0x126   : > { %3637 = vmatpush3.xpose.msk.msra.mxu1 %vm704_vm0, %v492_v55  ;;  %3604 = vmatprep.subr.msk.mxu0 %vm704_vm0, %v475_v56 }
 0x127   : > { %3638 = vmatprep.subr.msk.mxu1 %vm704_vm0, %v507_v57 }
 0x129   : > { %3605 = vmatpush3.xpose.msk.msra.mxu0 %vm704_vm0, %v459_v58  ;;  %v528_v58 = vld [vmem:[%s3789_s20 + $0xa70] sm:$0xff] }
 0x12a   : > { %3639 = vmatpush3.xpose.msk.msra.mxu1 %vm704_vm0, %v491_v59  ;;  %3606 = vmatprep.subr.msk.mxu0 %vm704_vm0, %v474_v60  ;;  %v560_v59 = vld [vmem:[%s3789_s20 + $0xb70] sm:$0xff] }
 0x12b   : > { %3640 = vmatprep.subr.msk.mxu1 %vm704_vm0, %v506_v61 }
 0x12d   : > { %3607 = vmatpush3.xpose.msk.msra.mxu0 %vm704_vm0, %v458_v63  ;;  %v543_v63 = vld [vmem:[%s3789_s20 + $0xae8] sm:$0xff] }
 0x12e   : > { %3641 = vmatpush3.xpose.msk.msra.mxu1 %vm704_vm0, %v490_v1  ;;  %3608 = vmatprep.subr.msk.mxu0 %vm704_vm0, %v473_v2  ;;  %v575_v1 = vld [vmem:[%s3789_s20 + $0xbe8] sm:$0xff] }
 0x12f   : > { %3642 = vmatprep.subr.msk.mxu1 %vm704_vm0, %v505_v3 }
 0x131   : > { %3609 = vmatpush3.xpose.msk.msra.mxu0 %vm704_vm0, %v457_v6  ;;  %v527_v6 = vld [vmem:[%s3789_s20 + $0xa68] sm:$0xff] }
 0x132   : > { %3643 = vmatpush3.xpose.msk.msra.mxu1 %vm704_vm0, %v489_v7  ;;  %3610 = vmatprep.subr.msk.mxu0 %vm704_vm0, %v472_v9  ;;  %v559_v7 = vld [vmem:[%s3789_s20 + $0xb68] sm:$0xff] }
 0x133   : > { %3644 = vmatprep.subr.msk.mxu1 %vm704_vm0, %v504_v10 }
 0x135   : > { %3611 = vmatpush3.xpose.msk.msra.mxu0 %vm704_vm0, %v456_v12  ;;  %v542_v12 = vld [vmem:[%s3789_s20 + $0xae0] sm:$0xff] }
 0x136   : > { %3645 = vmatpush3.xpose.msk.msra.mxu1 %vm704_vm0, %v488_v13  ;;  %3612 = vmatprep.subr.msk.mxu0 %vm704_vm0, %v471_v15  ;;  %v574_v13 = vld [vmem:[%s3789_s20 + $0xbe0] sm:$0xff] }
 0x137   : > { %3646 = vmatprep.subr.msk.mxu1 %vm704_vm0, %v503_v16  ;;  %v526_v16 = vld [vmem:[%s3789_s20 + $0xa60] sm:$0xff] }
 0x139   : > { %3613 = vmatpush3.xpose.msk.msra.mxu0 %vm704_vm0, %v455_v17  ;;  %v558_v17 = vld [vmem:[%s3789_s20 + $0xb60] sm:$0xff] }
 0x13a   : > { %3647 = vmatpush3.xpose.msk.msra.mxu1 %vm704_vm0, %v487_v0  ;;  %3614 = vmatprep.subr.msk.mxu0 %vm704_vm0, %v470_v18  ;;  %v541_v0 = vld [vmem:[%s3789_s20 + $0xad8] sm:$0xff] }
 0x13b   : > { %3648 = vmatprep.subr.msk.mxu1 %vm704_vm0, %v502_v19  ;;  %v573_v18 = vld [vmem:[%s3789_s20 + $0xbd8] sm:$0xff] }
 0x13c   : > { %v525_v19 = vld [vmem:[%s3789_s20 + $0xa58] sm:$0xff] }
 0x13d   : > { %3615 = vmatpush3.xpose.msk.msra.mxu0 %vm704_vm0, %v454_v20  ;;  %v557_v20 = vld [vmem:[%s3789_s20 + $0xb58] sm:$0xff] }
 0x13e   : > { %3649 = vmatpush3.xpose.msk.msra.mxu1 %vm704_vm0, %v486_v21  ;;  %3616 = vmatprep.subr.msk.mxu0 %vm704_vm0, %v469_v22  ;;  %v540_v21 = vld [vmem:[%s3789_s20 + $0xad0] sm:$0xff] }
 0x13f   : > { %3650 = vmatprep.subr.msk.mxu1 %vm704_vm0, %v501_v23  ;;  %v572_v22 = vld [vmem:[%s3789_s20 + $0xbd0] sm:$0xff] }
 0x140   : > { %v524_v23 = vld [vmem:[%s3789_s20 + $0xa50] sm:$0xff] }
 0x141   : > { %3617 = vmatpush3.xpose.msk.msra.mxu0 %vm704_vm0, %v453_v24  ;;  %v556_v24 = vld [vmem:[%s3789_s20 + $0xb50] sm:$0xff] }
 0x142   : > { %3651 = vmatpush3.xpose.msk.msra.mxu1 %vm704_vm0, %v485_v26  ;;  %3618 = vmatprep.subr.msk.mxu0 %vm704_vm0, %v468_v27  ;;  %v539_v26 = vld [vmem:[%s3789_s20 + $0xac8] sm:$0xff] }
 0x143   : > { %3652 = vmatprep.subr.msk.mxu1 %vm704_vm0, %v500_v28  ;;  %v571_v27 = vld [vmem:[%s3789_s20 + $0xbc8] sm:$0xff] }
 0x144   : > { %v523_v28 = vld [vmem:[%s3789_s20 + $0xa48] sm:$0xff] }
 0x145   : > { %3619 = vmatpush3.xpose.msk.msra.mxu0 %vm704_vm0, %v452_v29  ;;  %v555_v29 = vld [vmem:[%s3789_s20 + $0xb48] sm:$0xff] }
 0x146   : > { %3653 = vmatpush3.xpose.msk.msra.mxu1 %vm704_vm0, %v484_v30  ;;  %3620 = vmatprep.subr.msk.mxu0 %vm704_vm0, %v467_v31  ;;  %v538_v30 = vld [vmem:[%s3789_s20 + $0xac0] sm:$0xff] }
 0x147   : > { %3654 = vmatprep.subr.msk.mxu1 %vm704_vm0, %v499_v32  ;;  %v570_v31 = vld [vmem:[%s3789_s20 + $0xbc0] sm:$0xff] }
 0x148   : > { %v522_v32 = vld [vmem:[%s3789_s20 + $0xa40] sm:$0xff] }
 0x149   : > { %3621 = vmatpush3.xpose.msk.msra.mxu0 %vm704_vm0, %v451_v34  ;;  %v554_v34 = vld [vmem:[%s3789_s20 + $0xb40] sm:$0xff] }
 0x14a   : > { %3655 = vmatpush3.xpose.msk.msra.mxu1 %vm704_vm0, %v483_v35  ;;  %3622 = vmatprep.subr.msk.mxu0 %vm704_vm0, %v466_v36  ;;  %v537_v35 = vld [vmem:[%s3789_s20 + $0xab8] sm:$0xff] }
 0x14b   : > { %3656 = vmatprep.subr.msk.mxu1 %vm704_vm0, %v498_v37  ;;  %v569_v36 = vld [vmem:[%s3789_s20 + $0xbb8] sm:$0xff] }
 0x14c   : > { %v521_v37 = vld [vmem:[%s3789_s20 + $0xa38] sm:$0xff] }
 0x14d   : > { %3623 = vmatpush3.xpose.msk.msra.mxu0 %vm704_vm0, %v450_v40  ;;  %v553_v40 = vld [vmem:[%s3789_s20 + $0xb38] sm:$0xff] }
 0x14e   : > { %3657 = vmatpush3.xpose.msk.msra.mxu1 %vm704_vm0, %v482_v41  ;;  %3660 = vmatprep.subr.msk.mxu0 %vm704_vm0, %v545_v42  ;;  %v536_v41 = vld [vmem:[%s3789_s20 + $0xab0] sm:$0xff] }
 0x14f   : > { %3694 = vmatprep.subr.msk.mxu1 %vm704_vm0, %v577_v43  ;;  %v568_v42 = vld [vmem:[%s3789_s20 + $0xbb0] sm:$0xff] }
 0x150   : > { %v2068_v53 = vpop.f32.mrf.mxu0  ;;  %3625 = vmatmul.mubr.msk.f32.vlgmr.msra.gmra.mxu0 %vm704_vm0, %v4373_v25  ;;  %v520_v43 = vld [vmem:[%s3789_s20 + $0xa30] sm:$0xff] }
 0x151   : > { %v2139_v54 = vpop.f32.mrf.mxu1  ;;  %3659 = vmatmul.mubr.msk.f32.vlgmr.msra.gmra.mxu1 %vm704_vm0, %v4373_v25  ;;  %v2069_v55 = vadd.f32 %v2068_v53, %v603_v46  ;;  %3661 = vmatpush3.xpose.msk.msra.mxu0 %vm704_vm0, %v529_v48  ;;  %v552_v46 = vld [vmem:[%s3789_s20 + $0xb30] sm:$0xff]  ;;  %v567_v48 = vld [vmem:[%s3789_s20 + $0xba8] sm:$0xff]  ;;  %v550_v53 = vld [vmem:[%s3789_s20 + $0xb20] sm:$0xff] }
 0x152   : > { %v2140_v56 = vadd.f32 %v2139_v54, %v611_v47  ;;  %3695 = vmatpush3.xpose.msk.msra.mxu1 %vm704_vm0, %v561_v49  ;;  %v2070_v8 = vpop.f32.mrf.mxu0  ;;  %3662 = vmatprep.subr.msk.mxu0 %vm704_vm0, %v544_v51  ;;  %v535_v47 = vld [vmem:[%s3789_s20 + $0xaa8] sm:$0xff]  ;;  %v566_v51 = vld [vmem:[%s3789_s20 + $0xba0] sm:$0xff]  ;;  %v533_v54 = vld [vmem:[%s3789_s20 + $0xa98] sm:$0xff] }
 0x153   : > { %v2141_v57 = vpop.f32.mrf.mxu1  ;;  %3696 = vmatprep.subr.msk.mxu1 %vm704_vm0, %v576_v52  ;;  %v2071_v60 = vadd.f32 %v2070_v8, %v607_v62  ;;  %3692 = vmatprep.mubr.msk.f32.mxu0 %vm704_vm0, %v4373_v25  ;;  %v519_v49 = vld [vmem:[%s3789_s20 + $0xa28] sm:$0xff]  ;;  %v518_v52 = vld [vmem:[%s3789_s20 + $0xa20] sm:$0xff]  ;;  %v549_v8 = vld [vmem:[%s3789_s20 + $0xb18] sm:$0xff] }
 0x154   : > { %v2142_v61 = vadd.f32 %v2141_v57, %v615_v50  ;;  %3726 = vmatprep.mubr.msk.f32.mxu1 %vm704_vm0, %v4373_v25  ;;  %v551_v62 = vld [vmem:[%s3789_s20 + $0xb28] sm:$0xff]  ;;  %v534_v50 = vld [vmem:[%s3789_s20 + $0xaa0] sm:$0xff]  ;;  %v532_v57 = vld [vmem:[%s3789_s20 + $0xa90] sm:$0xff] }
 0x155   : > { %v2753_v2 = vcombine.low %v2069_v55, %v2071_v60  ;;  %3663 = vmatpush3.xpose.msk.msra.mxu0 %vm704_vm0, %v528_v58  ;;  %v565_v55 = vld [vmem:[%s3789_s20 + $0xb98] sm:$0xff]  ;;  %v564_v58 = vld [vmem:[%s3789_s20 + $0xb90] sm:$0xff] }
 0x156   : > { %v2754_v3 = vcombine.low %v2140_v56, %v2142_v61  ;;  %3697 = vmatpush3.xpose.msk.msra.mxu1 %vm704_vm0, %v560_v59  ;;  %3664 = vmatprep.subr.msk.mxu0 %vm704_vm0, %v543_v63  ;;  %v517_v56 = vld [vmem:[%s3789_s20 + $0xa18] sm:$0xff]  ;;  %v516_v59 = vld [vmem:[%s3789_s20 + $0xa10] sm:$0xff]  ;;  %v531_v61 = vld [vmem:[%s3789_s20 + $0xa88] sm:$0xff] }
 0x157   : > { %3698 = vmatprep.subr.msk.mxu1 %vm704_vm0, %v575_v1  ;;  %v2761_v9 = vrot.slane %v2753_v2, %v4386_v33  ;;  %v548_v60 = vld [vmem:[%s3789_s20 + $0xb10] sm:$0xff]  ;;  %v563_v63 = vld [vmem:[%s3789_s20 + $0xb88] sm:$0xff] }
 0x158   : > { %v2768_v10 = vrot.slane %v2754_v3, %v4386_v33  ;;  %v515_v1 = vld [vmem:[%s3789_s20 + $0xa08] sm:$0xff]  ;;  %v530_v3 = vld [vmem:[%s3789_s20 + $0xa80] sm:$0xff] }
 0x159   : > { %3665 = vmatpush3.xpose.msk.msra.mxu0 %vm704_vm0, %v527_v6  ;;  %v547_v2 = vld [vmem:[%s3789_s20 + $0xb08] sm:$0xff]  ;;  %v562_v6 = vld [vmem:[%s3789_s20 + $0xb80] sm:$0xff] }
 0x15a   : > { %v2769_v15 = vcombine.low %v2761_v9, %v2768_v10  ;;  %3699 = vmatpush3.xpose.msk.msra.mxu1 %vm704_vm0, %v559_v7  ;;  %3666 = vmatprep.subr.msk.mxu0 %vm704_vm0, %v542_v12  ;;  %v514_v7 = vld [vmem:[%s3789_s20 + $0xa00] sm:$0xff]  ;;  %v579_v10 = vld [vmem:[%s4329_s24 + $0x8] sm:$0xff] }
 0x15b   : > { %3700 = vmatprep.subr.msk.mxu1 %vm704_vm0, %v574_v13  ;;  %v546_v9 = vld [vmem:[%s3789_s20 + $0xb00] sm:$0xff]  ;;  %v619_v12 = vrot.slane %v579_v10, %v4334_v4  ;;  %v627_v13 = vrot.slane %v579_v10, %v4337_v5 }
 0x15c   : > { %2845 = vst [vmem:[%s4408_s30 + $0x8] sm:$0xff] %v2769_v15  ;;  %v623_v15 = vrot.slane %v579_v10, %v4349_v11 }
 0x15d   : > { %3667 = vmatpush3.xpose.msk.msra.mxu0 %vm704_vm0, %v526_v16  ;;  %v631_v16 = vrot.slane %v579_v10, %v4352_v14 }
 0x15e   : > { %3701 = vmatpush3.xpose.msk.msra.mxu1 %vm704_vm0, %v558_v17  ;;  %3668 = vmatprep.subr.msk.mxu0 %vm704_vm0, %v541_v0 }
 0x15f   : > { %3702 = vmatprep.subr.msk.mxu1 %vm704_vm0, %v573_v18 }
 0x161   : > { %3669 = vmatpush3.xpose.msk.msra.mxu0 %vm704_vm0, %v525_v19 }
 0x162   : > { %3703 = vmatpush3.xpose.msk.msra.mxu1 %vm704_vm0, %v557_v20  ;;  %3670 = vmatprep.subr.msk.mxu0 %vm704_vm0, %v540_v21 }
 0x163   : > { %3704 = vmatprep.subr.msk.mxu1 %vm704_vm0, %v572_v22 }
 0x165   : > { %3671 = vmatpush3.xpose.msk.msra.mxu0 %vm704_vm0, %v524_v23 }
 0x166   : > { %3705 = vmatpush3.xpose.msk.msra.mxu1 %vm704_vm0, %v556_v24  ;;  %3672 = vmatprep.subr.msk.mxu0 %vm704_vm0, %v539_v26 }
 0x167   : > { %3706 = vmatprep.subr.msk.mxu1 %vm704_vm0, %v571_v27 }
 0x169   : > { %3673 = vmatpush3.xpose.msk.msra.mxu0 %vm704_vm0, %v523_v28 }
 0x16a   : > { %3707 = vmatpush3.xpose.msk.msra.mxu1 %vm704_vm0, %v555_v29  ;;  %3674 = vmatprep.subr.msk.mxu0 %vm704_vm0, %v538_v30  ;;  %v635_v30 = vrot.slane %v579_v10, %v4510_v38 }
 0x16b   : > { %3708 = vmatprep.subr.msk.mxu1 %vm704_vm0, %v570_v31  ;;  %v643_v31 = vrot.slane %v579_v10, %v4513_v39 }
 0x16d   : > { %3675 = vmatpush3.xpose.msk.msra.mxu0 %vm704_vm0, %v522_v32  ;;  %v647_v32 = vrot.slane %v579_v10, %v4525_v45 }
 0x16e   : > { %3709 = vmatpush3.xpose.msk.msra.mxu1 %vm704_vm0, %v554_v34  ;;  %3676 = vmatprep.subr.msk.mxu0 %vm704_vm0, %v537_v35 }
 0x16f   : > { %3710 = vmatprep.subr.msk.mxu1 %vm704_vm0, %v569_v36 }
 0x171   : > { %3677 = vmatpush3.xpose.msk.msra.mxu0 %vm704_vm0, %v521_v37 }
 0x172   : > { %3711 = vmatpush3.xpose.msk.msra.mxu1 %vm704_vm0, %v553_v40  ;;  %3678 = vmatprep.subr.msk.mxu0 %vm704_vm0, %v536_v41 }
 0x173   : > { %3712 = vmatprep.subr.msk.mxu1 %vm704_vm0, %v568_v42 }
 0x175   : > { %3679 = vmatpush3.xpose.msk.msra.mxu0 %vm704_vm0, %v520_v43 }
 0x176   : > { %3713 = vmatpush3.xpose.msk.msra.mxu1 %vm704_vm0, %v552_v46  ;;  %3680 = vmatprep.subr.msk.mxu0 %vm704_vm0, %v535_v47 }
 0x177   : > { %3714 = vmatprep.subr.msk.mxu1 %vm704_vm0, %v567_v48 }
 0x179   : > { %3681 = vmatpush3.xpose.msk.msra.mxu0 %vm704_vm0, %v519_v49 }
 0x17a   : > { %3715 = vmatpush3.xpose.msk.msra.mxu1 %vm704_vm0, %v551_v62  ;;  %3682 = vmatprep.subr.msk.mxu0 %vm704_vm0, %v534_v50  ;;  %v580_v50 = vld [vmem:[%s4329_s24 + $0x10] sm:$0xff] }
 0x17b   : > { %3716 = vmatprep.subr.msk.mxu1 %vm704_vm0, %v566_v51  ;;  %v651_v51 = vrot.slane %v580_v50, %v4334_v4 }
 0x17d   : > { %3683 = vmatpush3.xpose.msk.msra.mxu0 %vm704_vm0, %v518_v52  ;;  %v659_v52 = vrot.slane %v580_v50, %v4337_v5 }
 0x17e   : > { %3717 = vmatpush3.xpose.msk.msra.mxu1 %vm704_vm0, %v550_v53  ;;  %3684 = vmatprep.subr.msk.mxu0 %vm704_vm0, %v533_v54  ;;  %v655_v53 = vrot.slane %v580_v50, %v4349_v11  ;;  %v663_v54 = vrot.slane %v580_v50, %v4352_v14  ;;  %v667_v11 = vrot.slane %v580_v50, %v4510_v38 }
 0x17f   : > { %3718 = vmatprep.subr.msk.mxu1 %vm704_vm0, %v565_v55  ;;  %v675_v14 = vrot.slane %v580_v50, %v4513_v39 }
 0x181   : > { %3685 = vmatpush3.xpose.msk.msra.mxu0 %vm704_vm0, %v517_v56 }
 0x182   : > { %3719 = vmatpush3.xpose.msk.msra.mxu1 %vm704_vm0, %v549_v8  ;;  %3686 = vmatprep.subr.msk.mxu0 %vm704_vm0, %v532_v57 }
 0x183   : > { %3720 = vmatprep.subr.msk.mxu1 %vm704_vm0, %v564_v58 }
 0x185   : > { %3687 = vmatpush3.xpose.msk.msra.mxu0 %vm704_vm0, %v516_v59 }
 0x186   : > { %3721 = vmatpush3.xpose.msk.msra.mxu1 %vm704_vm0, %v548_v60  ;;  %3688 = vmatprep.subr.msk.mxu0 %vm704_vm0, %v531_v61 }
 0x187   : > { %3722 = vmatprep.subr.msk.mxu1 %vm704_vm0, %v563_v63 }
 0x189   : > { %3689 = vmatpush3.xpose.msk.msra.mxu0 %vm704_vm0, %v515_v1 }
 0x18a   : > { %3723 = vmatpush3.xpose.msk.msra.mxu1 %vm704_vm0, %v547_v2  ;;  %3690 = vmatprep.subr.msk.mxu0 %vm704_vm0, %v530_v3  ;;  %v671_v3 = vrot.slane %v580_v50, %v4522_v44 }
 0x18b   : > { %3724 = vmatprep.subr.msk.mxu1 %vm704_vm0, %v562_v6  ;;  %v679_v6 = vrot.slane %v580_v50, %v4525_v45 }
 0x18d   : > { %3691 = vmatpush3.xpose.msk.msra.mxu0 %vm704_vm0, %v514_v7 }
 0x18e   : > { %3725 = vmatpush3.xpose.msk.msra.mxu1 %vm704_vm0, %v546_v9 }
 0x190   : > { %v2210_v17 = vpop.f32.mrf.mxu0  ;;  %3693 = vmatmul.mubr.msk.f32.vlgmr.msra.gmra.mxu0 %vm704_vm0, %v4373_v25 }
 0x191   : > { %v2281_v0 = vpop.f32.mrf.mxu1  ;;  %3727 = vmatmul.mubr.msk.f32.vlgmr.msra.gmra.mxu1 %vm704_vm0, %v4373_v25  ;;  %v2211_v18 = vadd.f32 %v2210_v17, %v619_v12  ;;  %v639_v25 = vrot.slane %v579_v10, %v4522_v44 }
 0x192   : > { %v2282_v19 = vadd.f32 %v2281_v0, %v627_v13  ;;  %v2212_v20 = vpop.f32.mrf.mxu0 }
 0x193   : > { %v2283_v21 = vpop.f32.mrf.mxu1  ;;  %v2213_v22 = vadd.f32 %v2212_v20, %v623_v15 }
 0x194   : > { %v2284_v23 = vadd.f32 %v2283_v21, %v631_v16 }
 0x195   : > { %v2770_v24 = vcombine.low %v2211_v18, %v2213_v22 }
 0x196   : > { %v2771_v26 = vcombine.low %v2282_v19, %v2284_v23 }
 0x197   : > { %v2778_v27 = vrot.slane %v2770_v24, %v4386_v33 }
 0x198   : > { %v2785_v28 = vrot.slane %v2771_v26, %v4386_v33 }
 0x19a   : > { %v2786_v29 = vcombine.low %v2778_v27, %v2785_v28 }
 0x19c   : > { %2846 = vst [vmem:[%s4408_s30 + $0x10] sm:$0xff] %v2786_v29 }
 0x1d0   : > { %v2352_v34 = vpop.f32.mrf.mxu0 }
 0x1d1   : > { %v2423_v35 = vpop.f32.mrf.mxu1  ;;  %v2353_v36 = vadd.f32 %v2352_v34, %v635_v30 }
 0x1d2   : > { %v2424_v37 = vadd.f32 %v2423_v35, %v643_v31  ;;  %v2354_v40 = vpop.f32.mrf.mxu0 }
 0x1d3   : > { %v2425_v41 = vpop.f32.mrf.mxu1  ;;  %v2355_v42 = vadd.f32 %v2354_v40, %v639_v25 }
 0x1d4   : > { %v2426_v43 = vadd.f32 %v2425_v41, %v647_v32 }
 0x1d5   : > { %v2787_v46 = vcombine.low %v2353_v36, %v2355_v42 }
 0x1d6   : > { %v2788_v47 = vcombine.low %v2424_v37, %v2426_v43 }
 0x1d7   : > { %v2795_v48 = vrot.slane %v2787_v46, %v4386_v33 }
 0x1d8   : > { %v2802_v49 = vrot.slane %v2788_v47, %v4386_v33 }
 0x1da   : > { %v2803_v62 = vcombine.low %v2795_v48, %v2802_v49 }
 0x1dc   : > { %2847 = vst [vmem:[%s4408_s30 + $0x18] sm:$0xff] %v2803_v62 }
 0x210   : > { %v2494_v55 = vpop.f32.mrf.mxu0 }
 0x211   : > { %v2565_v56 = vpop.f32.mrf.mxu1  ;;  %v2495_v8 = vadd.f32 %v2494_v55, %v651_v51 }
 0x212   : > { %v2566_v57 = vadd.f32 %v2565_v56, %v659_v52  ;;  %v2496_v58 = vpop.f32.mrf.mxu0 }
 0x213   : > { %v2567_v59 = vpop.f32.mrf.mxu1  ;;  %v2497_v60 = vadd.f32 %v2496_v58, %v655_v53 }
 0x214   : > { %v2568_v61 = vadd.f32 %v2567_v59, %v663_v54 }
 0x215   : > { %v2804_v63 = vcombine.low %v2495_v8, %v2497_v60 }
 0x216   : > { %v2805_v1 = vcombine.low %v2566_v57, %v2568_v61 }
 0x217   : > { %v2812_v2 = vrot.slane %v2804_v63, %v4386_v33 }
 0x218   : > { %v2819_v4 = vrot.slane %v2805_v1, %v4386_v33 }
 0x21a   : > { %v2820_v5 = vcombine.low %v2812_v2, %v2819_v4 }
 0x21c   : > { %2848 = vst [vmem:[%s4408_s30 + $0x20] sm:$0xff] %v2820_v5 }
 0x250   : > { %v2636_v7 = vpop.f32.mrf.mxu0 }
 0x251   : > { %v2707_v9 = vpop.f32.mrf.mxu1  ;;  %v2637_v13 = vadd.f32 %v2636_v7, %v667_v11 }
 0x252   : > { %v2638_v10 = vpop.f32.mrf.mxu0  ;;  %v2708_v15 = vadd.f32 %v2707_v9, %v675_v14 }
 0x253   : > { %v2709_v12 = vpop.f32.mrf.mxu1  ;;  %v2639_v16 = vadd.f32 %v2638_v10, %v671_v3 }
 0x254   : > { %v2710_v17 = vadd.f32 %v2709_v12, %v679_v6 }
 0x255   : > { %v2821_v0 = vcombine.low %v2637_v13, %v2639_v16 }
 0x256   : > { %v2822_v18 = vcombine.low %v2708_v15, %v2710_v17 }
 0x257   : > { %v2829_v19 = vrot.slane %v2821_v0, %v4386_v33 }
 0x258   : > { %v2836_v38 = vrot.slane %v2822_v18, %v4386_v33 }
 0x25a   : > { %v2837_v39 = vcombine.low %v2829_v19, %v2836_v38 }
 0x25c   : > { %2849 = vst [vmem:[%s4408_s30 + $0x28] sm:$0xff] %v2837_v39 }
 0x25d PF: > { %s13_s12 = sadd.s32 1, %s3744_s12  }
 0x25e   : > { %p10_p5 = scmp.ge.s32.totalorder %s13_s12, 5  }
 0x260   :  { %12 = sbr.rel (!%p10_p5) target bundleno = 1 (0x1), region = 65 }

</bundles_post_ra>
